<compile_context>
chip_gen: v7x
topology: tpu7x:2x2x1
jax: 0.10.0
libtpu: 0.0.40
codegen_flags: <defaults>
</compile_context>

<pallas_src>
import jax
import jax.numpy as jnp
from jax.experimental import pallas as pl
from jax.experimental.pallas import tpu as pltpu


# ----------------------------------------------------------------------------
# Small helpers
# ----------------------------------------------------------------------------
def _cdiv(a, b):
    return -(-a // b)


def _round_up(x, m):
    return _cdiv(x, m) * m


def _min_sublane(dtype):
    # 8 for 4-byte dtypes, 16 for bf16, 32 for int8 (sublane packing).
    return max(8, 32 // jnp.dtype(dtype).itemsize)


def _pad_rows(a, rows):
    pad = rows - a.shape[0]
    if pad == 0:
        return a
    cfg = [(0, pad)] + [(0, 0)] * (a.ndim - 1)
    return jnp.pad(a, cfg)


# ----------------------------------------------------------------------------
# Hardware introspection (cached, with safe fallbacks)
# ----------------------------------------------------------------------------
_NUM_TC = None
_VMEM_CAP = None
_SINGLE_BUFFER_OK = None


def _num_tensorcores():
    """TensorCores per chip: 2 on v7x (and v4/v5p megacore), else 1."""
    global _NUM_TC
    if _NUM_TC is not None:
        return _NUM_TC
    cores = 0
    try:
        info = pltpu.get_tpu_info()
        for attr in ("num_tensorcores", "tensorcore_count", "num_cores", "core_count"):
            v = getattr(info, attr, None)
            if isinstance(v, int) and v > 0:
                cores = v
                break
    except Exception:
        pass
    if cores <= 0:
        cores = 1
        try:
            kind = (getattr(jax.devices()[0], "device_kind", "") or "").lower()
            if "v7" in kind or "v4" in kind or "v5p" in kind:
                cores = 2
        except Exception:
            pass
    _NUM_TC = cores
    return cores


def _vmem_capacity_bytes():
    global _VMEM_CAP
    if _VMEM_CAP is not None:
        return _VMEM_CAP
    cap = 0
    try:
        info = pltpu.get_tpu_info()
        v = getattr(info, "vmem_capacity_bytes", None)
        if v:
            cap = int(v)
    except Exception:
        pass
    if cap <= 0:
        try:
            kind = (getattr(jax.devices()[0], "device_kind", "") or "").lower()
            cap = (64 << 20) if "v7" in kind else (128 << 20)
        except Exception:
            cap = 64 << 20  # conservative
    _VMEM_CAP = cap
    return cap


def _vmem_limit_bytes(*nbytes):
    # 2x for double-buffering + headroom for compiler-internal scratch.
    # Cap at 3/4 of physical VMEM (~48 MiB v7x, ~96 MiB v5e/v6e) per review.
    est = 2 * int(sum(int(b) for b in nbytes)) + (4 << 20)
    hard_cap = (_vmem_capacity_bytes() * 3) // 4
    floor = min(32 << 20, hard_cap)
    return int(min(max(est, floor), hard_cap))


def _single_buffer_consts_ok():
    """Probe once whether pipeline_mode=pl.Buffered(1) lowers on this setup."""
    global _SINGLE_BUFFER_OK
    if _SINGLE_BUFFER_OK is not None:
        return _SINGLE_BUFFER_OK
    try:
        def _probe(c_ref, o_ref):
            o_ref[...] = c_ref[...] + 1.0

        c = jnp.zeros((8, 128), jnp.float32)
        out = pl.pallas_call(
            _probe,
            out_shape=jax.ShapeDtypeStruct((16, 128), jnp.float32),
            grid=(2,),
            in_specs=[pl.BlockSpec((8, 128), lambda i: (0, 0),
                                   pipeline_mode=pl.Buffered(1))],
            out_specs=pl.BlockSpec((8, 128), lambda i: (i, 0)),
        )(c)
        jax.block_until_ready(out)
        _SINGLE_BUFFER_OK = True
    except Exception:
        _SINGLE_BUFFER_OK = False
    return _SINGLE_BUFFER_OK


def _const_spec(block_shape):
    """BlockSpec for a grid-invariant (constant-index) input.

    Single-buffered when supported so the node table / weights don't double
    their VMEM footprint (their block index never changes)."""
    zeros = (0,) * len(block_shape)
    if _single_buffer_consts_ok():
        return pl.BlockSpec(block_shape, lambda *_: zeros,
                            pipeline_mode=pl.Buffered(1))
    return pl.BlockSpec(block_shape, lambda *_: zeros)


def _pick_tile(n_rows, tile_e, *, min_sublane=8, num_cores=1):
    """Largest sublane-aligned tile <= tile_e.  Only on multi-TC chips (v7x)
    do we shrink the tile to guarantee >= num_cores grid steps; on 1-TC chips
    a single big tile avoids per-grid-step overhead."""
    t = max(min_sublane,
            min(_round_up(tile_e, min_sublane), _round_up(n_rows, min_sublane)))
    if num_cores > 1:
        while t > min_sublane and _cdiv(n_rows, t) < num_cores:
            t = max(min_sublane, _round_up(t // 2, min_sublane))
    return t


# ----------------------------------------------------------------------------
# In-kernel building blocks (traced helpers)
# ----------------------------------------------------------------------------
def _gather_rows(rep, idx_col, out_dtype):
    """Gather rows of `rep` [N, F] selected by `idx_col` [T, 1] (int32) via a
    one-hot matmul on the MXU.  Exact: each output row is a single rep row,
    so accumulating directly in `out_dtype` (e.g. bf16) loses nothing."""
    n = rep.shape[0]
    iota = jax.lax.broadcasted_iota(jnp.int32, (idx_col.shape[0], n), 1)
    one_hot = jnp.where(idx_col == iota, 1.0, 0.0).astype(rep.dtype)
    return jnp.dot(one_hot, rep, preferred_element_type=out_dtype)


def _rowsum_lane_dense(prod_f32):
    """[T, F] f32 -> [1, T] f32 row-sums via a tiny ones-vector MXU matmul.

    Emitting scores along the lane axis keeps the output store lane-dense
    (unmasked vst) instead of T/8 single-useful-lane masked stores."""
    ones = jnp.ones((1, prod_f32.shape[1]), dtype=prod_f32.dtype)
    return jax.lax.dot_general(
        ones, prod_f32,
        dimension_numbers=(((1,), (1,)), ((), ())),
        preferred_element_type=jnp.float32)


def _cross_score(src, dst, w1s, w1d, b1, w2l, w2r, b2l, b2r):
    """[1, T] scores with
         h1    = concat([src, dst]) @ W1 + b1  (split as src@W1s + dst@W1d)
         left  = h1 @ W2[:, :F] + b2[:F]
         right = h1 @ W2[:, F:] + b2[F:]
         score = sum(left * right, -1)
    Splitting W2 keeps both operands lane-dense MXU outputs (no XLU slice)."""
    h1 = (jnp.dot(src, w1s, preferred_element_type=jnp.float32)
          + jnp.dot(dst, w1d, preferred_element_type=jnp.float32)
          + b1)                                   # [T, 2F] f32
    h1 = h1.astype(w2l.dtype)                     # matmul operand dtype
    left = jnp.dot(h1, w2l, preferred_element_type=jnp.float32) + b2l
    right = jnp.dot(h1, w2r, preferred_element_type=jnp.float32) + b2r
    return _rowsum_lane_dense(left * right)       # [1, T] f32


# ----------------------------------------------------------------------------
# Kernels
# ----------------------------------------------------------------------------
def _dot_fused_kernel(rep_ref, sidx_ref, didx_ref, out_ref):
    rep = rep_ref[...]
    src = _gather_rows(rep, sidx_ref[...], jnp.float32)
    dst = _gather_rows(rep, didx_ref[...], jnp.float32)
    out_ref[...] = _rowsum_lane_dense(src * dst)


def _cross_fused_kernel(rep_ref, sidx_ref, didx_ref,
                        w1s_ref, w1d_ref, b1_ref,
                        w2l_ref, w2r_ref, b2l_ref, b2r_ref,
                        out_ref):
    rep = rep_ref[...]
    src = _gather_rows(rep, sidx_ref[...], rep.dtype)   # exact in rep dtype
    dst = _gather_rows(rep, didx_ref[...], rep.dtype)
    out_ref[...] = _cross_score(src, dst,
                                w1s_ref[...], w1d_ref[...], b1_ref[...],
                                w2l_ref[...], w2r_ref[...],
                                b2l_ref[...], b2r_ref[...])


def _dot_pregathered_kernel(src_ref, dst_ref, out_ref):
    prod = src_ref[...].astype(jnp.float32) * dst_ref[...].astype(jnp.float32)
    out_ref[...] = _rowsum_lane_dense(prod)


def _cross_pregathered_kernel(src_ref, dst_ref,
                              w1s_ref, w1d_ref, b1_ref,
                              w2l_ref, w2r_ref, b2l_ref, b2r_ref,
                              out_ref):
    out_ref[...] = _cross_score(src_ref[...], dst_ref[...],
                                w1s_ref[...], w1d_ref[...], b1_ref[...],
                                w2l_ref[...], w2r_ref[...],
                                b2l_ref[...], b2r_ref[...])


# ----------------------------------------------------------------------------
# Pallas wrappers
# ----------------------------------------------------------------------------
def _score_dot_fused(rep, src_idx, dst_idx, *, tile_e):
    n, f = rep.shape
    e = src_idx.shape[0]
    t = _pick_tile(e, tile_e, min_sublane=_min_sublane(rep.dtype),
                   num_cores=_num_tensorcores())
    e_pad = _round_up(e, t)
    n_tiles = e_pad // t
    sidx = _pad_rows(src_idx.astype(jnp.int32), e_pad).reshape(e_pad, 1)
    didx = _pad_rows(dst_idx.astype(jnp.int32), e_pad).reshape(e_pad, 1)
    row = lambda i: (i, 0)
    onehot_bytes = 2 * t * n * rep.dtype.itemsize
    out = pl.pallas_call(
        _dot_fused_kernel,
        out_shape=jax.ShapeDtypeStruct((n_tiles, t), jnp.float32),
        grid_spec=pltpu.PrefetchScalarGridSpec(
            num_scalar_prefetch=0,
            grid=(n_tiles,),
            in_specs=[
                _const_spec((n, f)),              # node table (VMEM-resident)
                pl.BlockSpec((t, 1), row),        # src indices
                pl.BlockSpec((t, 1), row),        # dst indices
            ],
            out_specs=pl.BlockSpec((1, t), row),  # lane-dense scores
        ),
        compiler_params=pltpu.CompilerParams(
            dimension_semantics=("parallel",),
            vmem_limit_bytes=_vmem_limit_bytes(
                rep.nbytes, 2 * t * 4, onehot_bytes, 2 * t * f * 4, t * 4)),
    )(rep, sidx, didx)
    return out.reshape(-1)[:e]


def _score_cross_fused(rep, src_idx, dst_idx, params, *, tile_e):
    n, f = rep.shape
    f2 = 2 * f
    e = src_idx.shape[0]
    t = _pick_tile(e, tile_e, min_sublane=_min_sublane(rep.dtype),
                   num_cores=_num_tensorcores())
    e_pad = _round_up(e, t)
    n_tiles = e_pad // t
    sidx = _pad_rows(src_idx.astype(jnp.int32), e_pad).reshape(e_pad, 1)
    didx = _pad_rows(dst_idx.astype(jnp.int32), e_pad).reshape(e_pad, 1)
    row = lambda i: (i, 0)
    weight_bytes = sum(int(p.nbytes) for p in params)
    onehot_bytes = 2 * t * n * rep.dtype.itemsize
    out = pl.pallas_call(
        _cross_fused_kernel,
        out_shape=jax.ShapeDtypeStruct((n_tiles, t), jnp.float32),
        grid_spec=pltpu.PrefetchScalarGridSpec(
            num_scalar_prefetch=0,
            grid=(n_tiles,),
            in_specs=[
                _const_spec((n, f)),             # node table (VMEM-resident)
                pl.BlockSpec((t, 1), row),       # src indices
                pl.BlockSpec((t, 1), row),       # dst indices
                _const_spec((f, f2)),            # W1 src half
                _const_spec((f, f2)),            # W1 dst half
                _const_spec((1, f2)),            # b1
                _const_spec((f2, f)),            # W2 left half
                _const_spec((f2, f)),            # W2 right half
                _const_spec((1, f)),             # b2 left
                _const_spec((1, f)),             # b2 right
            ],
            out_specs=pl.BlockSpec((1, t), row),
        ),
        compiler_params=pltpu.CompilerParams(
            dimension_semantics=("parallel",),
            vmem_limit_bytes=_vmem_limit_bytes(
                rep.nbytes, weight_bytes, 2 * t * 4, onehot_bytes,
                4 * t * f2 * 4, t * 4)),
    )(rep, sidx, didx, *params)
    return out.reshape(-1)[:e]


def _score_dot_pregathered(src_emb, dst_emb, *, tile_e):
    e, f = src_emb.shape
    t = _pick_tile(e, tile_e, min_sublane=_min_sublane(src_emb.dtype),
                   num_cores=_num_tensorcores())
    e_pad = _round_up(e, t)
    n_tiles = e_pad // t
    src_emb = _pad_rows(src_emb, e_pad)
    dst_emb = _pad_rows(dst_emb, e_pad)
    row = lambda i: (i, 0)
    out = pl.pallas_call(
        _dot_pregathered_kernel,
        out_shape=jax.ShapeDtypeStruct((n_tiles, t), jnp.float32),
        grid_spec=pltpu.PrefetchScalarGridSpec(
            num_scalar_prefetch=0,
            grid=(n_tiles,),
            in_specs=[pl.BlockSpec((t, f), row),
                      pl.BlockSpec((t, f), row)],
            out_specs=pl.BlockSpec((1, t), row),
        ),
        compiler_params=pltpu.CompilerParams(
            dimension_semantics=("parallel",),
            vmem_limit_bytes=_vmem_limit_bytes(
                2 * t * f * src_emb.dtype.itemsize, t * 4)),
    )(src_emb, dst_emb)
    return out.reshape(-1)[:e]


def _score_cross_pregathered(src_emb, dst_emb, params, *, tile_e):
    e, f = src_emb.shape
    f2 = 2 * f
    t = _pick_tile(e, tile_e, min_sublane=_min_sublane(src_emb.dtype),
                   num_cores=_num_tensorcores())
    e_pad = _round_up(e, t)
    n_tiles = e_pad // t
    src_emb = _pad_rows(src_emb, e_pad)
    dst_emb = _pad_rows(dst_emb, e_pad)
    row = lambda i: (i, 0)
    out = pl.pallas_call(
        _cross_pregathered_kernel,
        out_shape=jax.ShapeDtypeStruct((n_tiles, t), jnp.float32),
        grid_spec=pltpu.PrefetchScalarGridSpec(
            num_scalar_prefetch=0,
            grid=(n_tiles,),
            in_specs=[
                pl.BlockSpec((t, f), row),
                pl.BlockSpec((t, f), row),
                _const_spec((f, f2)),
                _const_spec((f, f2)),
                _const_spec((1, f2)),
                _const_spec((f2, f)),
                _const_spec((f2, f)),
                _const_spec((1, f)),
                _const_spec((1, f)),
            ],
            out_specs=pl.BlockSpec((1, t), row),
        ),
        compiler_params=pltpu.CompilerParams(
            dimension_semantics=("parallel",),
            vmem_limit_bytes=_vmem_limit_bytes(
                2 * t * f * src_emb.dtype.itemsize,
                sum(int(p.nbytes) for p in params),
                4 * t * f2 * 4, t * 4)),
    )(src_emb, dst_emb, *params)
    return out.reshape(-1)[:e]


# ----------------------------------------------------------------------------
# Module-equivalent wrapper
# ----------------------------------------------------------------------------
class ScorePredictorPallas:
    """JAX/Pallas equivalent of ScorePredictor.forward (sample <= 0)."""

    # Fuse the edge gather into the kernel only for small node tables: the
    # per-tile [t, N] one-hot costs ~t*N*itemsize of VMEM/vregs and 2*t*N*F
    # MXU FLOPs per side, so gate on N (not table bytes).
    _FUSE_GATHER_MAX_NODES = 2048
    _FUSE_GATHER_MAX_BYTES = 4 << 20
    _ONEHOT_TILE_BUDGET = 1 << 20   # per-one-hot bytes cap when picking tiles

    def __init__(self, out_features, cross_score=False, sample=0,
                 compute_dtype=jnp.bfloat16, key=None):
        self.out_features = out_features
        self.cross_score = cross_score
        self.sample = sample
        self.compute_dtype = jnp.dtype(compute_dtype)
        if cross_score:
            key = key if key is not None else jax.random.PRNGKey(0)
            k1, k2, k3, k4 = jax.random.split(key, 4)
            f2 = 2 * out_features
            bound = 1.0 / (f2 ** 0.5)       # nn.Linear default uniform bound
            # Stored pre-transposed: y = x @ W + b  (x: [E, 2F], W: [2F, 2F]).
            self.w1 = jax.random.uniform(k1, (f2, f2), jnp.float32, -bound, bound)
            self.b1 = jax.random.uniform(k2, (f2,), jnp.float32, -bound, bound)
            self.w2 = jax.random.uniform(k3, (f2, f2), jnp.float32, -bound, bound)
            self.b2 = jax.random.uniform(k4, (f2,), jnp.float32, -bound, bound)

    def _split_params(self):
        f = self.out_features
        cdt = self.compute_dtype
        # W1 split by input half (avoids in-kernel concat); W2 split by output
        # half (keeps the final elementwise product lane-dense, no XLU slice).
        # Biases stay f32 (post-matmul elementwise math is f32 on all gens).
        return (self.w1[:f, :].astype(cdt),
                self.w1[f:, :].astype(cdt),
                self.b1.reshape(1, 2 * f).astype(jnp.float32),
                self.w2[:, :f].astype(cdt),
                self.w2[:, f:].astype(cdt),
                self.b2[:f].reshape(1, f).astype(jnp.float32),
                self.b2[f:].reshape(1, f).astype(jnp.float32))

    def forward(self, x, src_idx, dst_idx, *, tile_e=None, fuse_gather=None):
        """x: node GNN_Emb [N, 2F]; src_idx/dst_idx: int32 [E] edge endpoints."""
        f = self.out_features
        # get_representation (sample <= 0): first F features.  Cheap node-sized
        # slice/cast in XLA; the expensive per-edge gather is fused below.
        rep = x[:, :f].astype(self.compute_dtype)
        n = rep.shape[0]
        if fuse_gather is None:
            fuse_gather = (n <= self._FUSE_GATHER_MAX_NODES
                           and int(rep.nbytes) <= self._FUSE_GATHER_MAX_BYTES)
        if tile_e is None:
            if fuse_gather:
                # Large tiles amortize per-step overhead; cap so each [t, N]
                # one-hot stays within ~1 MiB of vregs/VMEM.
                per_row = max(1, n * self.compute_dtype.itemsize)
                tile_e = int(min(2048, max(128, self._ONEHOT_TILE_BUDGET // per_row)))
            else:
                # Per-edge block cost is 2*F*itemsize; keep the per-step block
                # within ~1/8 of physical VMEM (double-buffered x 2 inputs).
                per_edge = max(1, 2 * f * self.compute_dtype.itemsize + 4)
                budget = max(1 << 20, _vmem_capacity_bytes() // 8)
                tile_e = int(min(2048, max(128, budget // per_edge)))
        if fuse_gather:
            if self.cross_score:
                return _score_cross_fused(rep, src_idx, dst_idx,
                                          self._split_params(), tile_e=tile_e)
            return _score_dot_fused(rep, src_idx, dst_idx, tile_e=tile_e)
        # Fallback: node table too large for VMEM residency -> gather in XLA.
        src_emb = jnp.take(rep, src_idx, axis=0)
        dst_emb = jnp.take(rep, dst_idx, axis=0)
        if self.cross_score:
            return _score_cross_pregathered(src_emb, dst_emb,
                                            self._split_params(), tile_e=tile_e)
        return _score_dot_pregathered(src_emb, dst_emb, tile_e=tile_e)


# ----------------------------------------------------------------------------
# Reference (pure JAX) for verification.  With compute_dtype=f32 this is the
# exact module semantics; otherwise it mirrors the kernel's dtype policy
# (low-precision matmul operands, f32 accumulation, f32 elementwise tail).
# ----------------------------------------------------------------------------
def _reference(model, x, src_idx, dst_idx):
    f = model.out_features
    cdt = model.compute_dtype
    rep = x[:, :f].astype(cdt)
    s = rep[src_idx]
    d = rep[dst_idx]
    if model.cross_score:
        cat = jnp.concatenate([s, d], axis=1)
        h1 = jnp.dot(cat, model.w1.astype(cdt),
                     preferred_element_type=jnp.float32) + model.b1
        h1 = h1.astype(cdt)
        h2 = jnp.dot(h1, model.w2.astype(cdt),
                     preferred_element_type=jnp.float32) + model.b2
        return jnp.sum(h2[:, :f] * h2[:, f:], axis=1)
    return jnp.sum(s.astype(jnp.float32) * d.astype(jnp.float32), axis=1)


if __name__ == "__main__":
    key = jax.random.PRNGKey(0)
    kx, ks, kd, kp = jax.random.split(key, 4)

    F = 32     # out_features
    N = 128    # number of graph nodes
    E = 512    # number of scoring edges

    x = jax.random.normal(kx, (N, 2 * F), jnp.float32)          # GNN_Emb
    src_idx = jax.random.randint(ks, (E,), 0, N, jnp.int32)
    dst_idx = jax.random.randint(kd, (E,), 0, N, jnp.int32)

    cases = []

    # Fused-gather kernels, exact f32 (matches the PyTorch module semantics).
    m = ScorePredictorPallas(F, cross_score=False, compute_dtype=jnp.float32)
    cases.append(("dot/f32/fused", m.forward(x, src_idx, dst_idx),
                  _reference(m, x, src_idx, dst_idx), 1e-4, 1e-4))

    m = ScorePredictorPallas(F, cross_score=True, compute_dtype=jnp.float32, key=kp)
    cases.append(("cross/f32/fused", m.forward(x, src_idx, dst_idx),
                  _reference(m, x, src_idx, dst_idx), 1e-3, 1e-3))

    # bf16 operands + f32 accumulation (the bandwidth-optimized configuration).
    m = ScorePredictorPallas(F, cross_score=False, compute_dtype=jnp.bfloat16)
    cases.append(("dot/bf16/fused", m.forward(x, src_idx, dst_idx),
                  _reference(m, x, src_idx, dst_idx), 5e-2, 5e-2))

    m = ScorePredictorPallas(F, cross_score=True, compute_dtype=jnp.bfloat16, key=kp)
    cases.append(("cross/bf16/fused", m.forward(x, src_idx, dst_idx),
                  _reference(m, x, src_idx, dst_idx), 5e-2, 5e-2))

    # Fallback path (node table assumed too large for VMEM): wrapper gather.
    m = ScorePredictorPallas(F, cross_score=False, compute_dtype=jnp.float32)
    cases.append(("dot/f32/pregathered",
                  m.forward(x, src_idx, dst_idx, fuse_gather=False),
                  _reference(m, x, src_idx, dst_idx), 1e-4, 1e-4))

    m = ScorePredictorPallas(F, cross_score=True, compute_dtype=jnp.float32, key=kp)
    cases.append(("cross/f32/pregathered",
                  m.forward(x, src_idx, dst_idx, fuse_gather=False),
                  _reference(m, x, src_idx, dst_idx), 1e-3, 1e-3))

    ok = True
    for name, got, want, atol, rtol in cases:
        got = jax.block_until_ready(got)
        good = bool(jnp.allclose(got, want, atol=atol, rtol=rtol))
        if not good:
            err = float(jnp.max(jnp.abs(got - want)))
            print(f"MISMATCH {name}: max abs err {err:.3e}")
        ok &= good

    if not ok:
        raise SystemExit("mismatch vs reference")
    print("KERNEL_OK")
</pallas_src>

<mosaic_0001>
module attributes {stable_mosaic.version = 11 : i64} {
  func.func @_probe(%arg0: i32, %arg1: memref<8x128xf32, #tpu.memory_space<vmem>>, %arg2: memref<8x128xf32, #tpu.memory_space<vmem>>) attributes {dimension_semantics = [#tpu.dimension_semantics<arbitrary>], iteration_bounds = array<i64: 2>, scalar_prefetch = 0 : i64, scratch_operands = 0 : i64, tpu.core_type = #tpu.core_type<tc>, window_params = [{pipeline_mode = #tpu.pipeline_mode<synchronous>, transform_indices = @transform_0, window_bounds = array<i64: 8, 128>}, {transform_indices = @transform_1, window_bounds = array<i64: 8, 128>}]} {
    %c0 = arith.constant 0 : index
    %c0_0 = arith.constant 0 : index
    %0 = vector.load %arg1[%c0, %c0_0] : memref<8x128xf32, #tpu.memory_space<vmem>>, vector<8x128xf32>
    %cst = arith.constant 1.000000e+00 : f32
    %1 = vector.broadcast %cst : f32 to vector<8x128xf32>
    %2 = arith.addf %0, %1 : vector<8x128xf32>
    %c0_1 = arith.constant 0 : index
    %c0_2 = arith.constant 0 : index
    %3 = vector.load %arg2[%c0_1, %c0_2] : memref<8x128xf32, #tpu.memory_space<vmem>>, vector<8x128xf32>
    tpu.vector_store %arg2[%c0_1, %c0_2], %2 {strides = array<i32>} : memref<8x128xf32, #tpu.memory_space<vmem>>, vector<8x128xf32>,
    return
  }
  func.func @transform_0(%arg0: i32) -> (i32, i32) {
    %c0_i32 = arith.constant 0 : i32
    %c0_i32_0 = arith.constant 0 : i32
    %c0_i32_1 = arith.constant 0 : i32
    return %c0_i32, %c0_i32_0 : i32, i32
  }
  func.func @transform_1(%arg0: i32) -> (i32, i32) {
    %c0_i32 = arith.constant 0 : i32
    %c0_i32_0 = arith.constant 0 : i32
    return %arg0, %c0_i32 : i32, i32
  }
}

module attributes {stable_mosaic.version = 11 : i64} {
  func.func @_dot_fused_kernel(%arg0: i32, %arg1: memref<128x32xf32, #tpu.memory_space<vmem>>, %arg2: memref<512x1xi32, #tpu.memory_space<vmem>>, %arg3: memref<512x1xi32, #tpu.memory_space<vmem>>, %arg4: memref<1x512xf32, #tpu.memory_space<vmem>>) attributes {dimension_semantics = [#tpu.dimension_semantics<parallel>], iteration_bounds = array<i64: 1>, scalar_prefetch = 0 : i64, scratch_operands = 0 : i64, tpu.core_type = #tpu.core_type<tc>, window_params = [{pipeline_mode = #tpu.pipeline_mode<synchronous>, transform_indices = @transform_0, window_bounds = array<i64: 128, 32>}, {transform_indices = @transform_1, window_bounds = array<i64: 512, 1>}, {transform_indices = @transform_2, window_bounds = array<i64: 512, 1>}, {transform_indices = @transform_3, window_bounds = array<i64: 1, 512>}]} {
    %c0 = arith.constant 0 : index
    %c0_0 = arith.constant 0 : index
    %0 = vector.load %arg1[%c0, %c0_0] : memref<128x32xf32, #tpu.memory_space<vmem>>, vector<128x32xf32>
    %c0_1 = arith.constant 0 : index
    %c0_2 = arith.constant 0 : index
    %1 = vector.load %arg2[%c0_1, %c0_2] : memref<512x1xi32, #tpu.memory_space<vmem>>, vector<512x1xi32>
    %2 = tpu.iota {dimensions = array<i32: 1>} : vector<512x128xi32>
    %3 = vector.broadcast %1 : vector<512x1xi32> to vector<512x128xi32>
    %4 = arith.cmpi eq, %3, %2 : vector<512x128xi32>
    %cst = arith.constant 1.000000e+00 : f32
    %cst_3 = arith.constant 0.000000e+00 : f32
    %5 = vector.broadcast %cst : f32 to vector<512x128xf32>
    %6 = vector.broadcast %cst_3 : f32 to vector<512x128xf32>
    %7 = arith.select %4, %5, %6 : vector<512x128xi1>, vector<512x128xf32>
    %cst_4 = arith.constant dense<0.000000e+00> : vector<512x32xf32>
    %8 = tpu.matmul %7, %0, %cst_4 {dimension_numbers = #tpu.dot_dimension_numbers<[1], [0], [0], [1], [0, 0, 1, 1], [], []>} : vector<512x128xf32>, vector<128x32xf32>, vector<512x32xf32> -> vector<512x32xf32>
    %c0_5 = arith.constant 0 : index
    %c0_6 = arith.constant 0 : index
    %9 = vector.load %arg3[%c0_5, %c0_6] : memref<512x1xi32, #tpu.memory_space<vmem>>, vector<512x1xi32>
    %10 = tpu.iota {dimensions = array<i32: 1>} : vector<512x128xi32>
    %11 = vector.broadcast %9 : vector<512x1xi32> to vector<512x128xi32>
    %12 = arith.cmpi eq, %11, %10 : vector<512x128xi32>
    %cst_7 = arith.constant 1.000000e+00 : f32
    %cst_8 = arith.constant 0.000000e+00 : f32
    %13 = vector.broadcast %cst_7 : f32 to vector<512x128xf32>
    %14 = vector.broadcast %cst_8 : f32 to vector<512x128xf32>
    %15 = arith.select %12, %13, %14 : vector<512x128xi1>, vector<512x128xf32>
    %cst_9 = arith.constant dense<0.000000e+00> : vector<512x32xf32>
    %16 = tpu.matmul %15, %0, %cst_9 {dimension_numbers = #tpu.dot_dimension_numbers<[1], [0], [0], [1], [0, 0, 1, 1], [], []>} : vector<512x128xf32>, vector<128x32xf32>, vector<512x32xf32> -> vector<512x32xf32>
    %17 = arith.mulf %8, %16 : vector<512x32xf32>
    %cst_10 = arith.constant 1.000000e+00 : f32
    %18 = vector.broadcast %cst_10 : f32 to vector<1x32xf32>
    %cst_11 = arith.constant dense<0.000000e+00> : vector<1x512xf32>
    %19 = tpu.matmul %18, %17, %cst_11 {dimension_numbers = #tpu.dot_dimension_numbers<[1], [1], [0], [0], [0, 0, 1, 0], [], []>} : vector<1x32xf32>, vector<512x32xf32>, vector<1x512xf32> -> vector<1x512xf32>
    %c0_12 = arith.constant 0 : index
    %c0_13 = arith.constant 0 : index
    %20 = vector.load %arg4[%c0_12, %c0_13] : memref<1x512xf32, #tpu.memory_space<vmem>>, vector<1x512xf32>
    tpu.vector_store %arg4[%c0_12, %c0_13], %19 {strides = array<i32>} : memref<1x512xf32, #tpu.memory_space<vmem>>, vector<1x512xf32>,
    return
  }
  func.func @transform_0(%arg0: i32) -> (i32, i32) {
    %c0_i32 = arith.constant 0 : i32
    %c0_i32_0 = arith.constant 0 : i32
    %c0_i32_1 = arith.constant 0 : i32
    return %c0_i32, %c0_i32_0 : i32, i32
  }
  func.func @transform_1(%arg0: i32) -> (i32, i32) {
    %c0_i32 = arith.constant 0 : i32
    %c0_i32_0 = arith.constant 0 : i32
    return %arg0, %c0_i32 : i32, i32
  }
  func.func @transform_2(%arg0: i32) -> (i32, i32) {
    %c0_i32 = arith.constant 0 : i32
    %c0_i32_0 = arith.constant 0 : i32
    return %arg0, %c0_i32 : i32, i32
  }
  func.func @transform_3(%arg0: i32) -> (i32, i32) {
    %c0_i32 = arith.constant 0 : i32
    %c0_i32_0 = arith.constant 0 : i32
    return %arg0, %c0_i32 : i32, i32
  }
}

</mosaic_0001>

<bundles_post_ra>
// kernel: tpu_custom_call.1
= control target key start
LH: loop header
LB: loop body
LE: loop exit
PB: predicated region body
PF: predicated region fallthrough
CT: control target
= control target key end

     0   :  { %6 = vsyncpa [#allocation3], 0  ;;  %s482_s0 = inlined_call_operand.hbm [shape: f32[8,128], index: 0, kind: input, shape index: {}]   ;;  %s483_s1 = inlined_call_operand.hbm [shape: f32[16,128], index: 1, kind: output, shape index: {}]  }
   0x1   :  { %7 = vsyncpa [#allocation4], 0 }
   0x2   :  { %9 = vsyncpa [#allocation4 + $0x1], 0  ;;  %s352_s6 = smov 0   ;;  %s354_s7 = smov 0  }
   0x3   :  { %s356_s8 = smov 0   ;;  %s358_s9 = smov 0  }
   0x4 LB: > { %s373_s10 = sadd.s32 4294967295, %s338_s9   ;;  %s184_s11 = sadd.s32 4294967294, %s338_s9   ;;  %s338_s9 = sphi %s358_s9, %s499_s9   ;;  %s334_s8 = sphi %s356_s8, %s498_s8   ;;  %s330_s7 = sphi %s354_s7, %s497_s7   ;;  %s326_s6 = sphi %s352_s6, %s496_s6  }
   0x5   : > { %s377_s12 = sadd.s32 1, %s338_s9   ;;  %s43_s13 = sadd.s32 1, %s334_s8 }
   0x6   : > { %s40_s14 = ssub.s32 %s338_s9, %s377_s12  ;;  %p53_p0 = scmp.ne.s32.totalorder %s334_s8, %s330_s7 }
   0x7   : > { %p41_p1 = scmp.eq.s32.totalorder %s40_s14, 0  ;;  %p54_p2 = scmp.eq.s32.totalorder %s373_s10, 1 }
   0x8   : > { %p59_p3 = scmp.ne.s32.totalorder %s330_s7, %s326_s6  ;;  %p60_p4 = scmp.eq.s32.totalorder %s184_s11, 1 }
   0x9   : > { %s388_s15 = scalar_select %p41_p1, %s334_s8, %s43_s13  }
   0xa   : > { %p390_p5 = por %p54_p2, %p53_p0  ;;  %p394_p6 = por %p60_p4, %p59_p3 }
   0xb   : > { %p185_p7 = scmp.ge.s32.totalorder %s338_s9, 1  ;;  %p67_p8 = scmp.lt.s32.totalorder %s338_s9, 3 }
   0xc   : > { %s487_s16 = scalar_select %p390_p5, 1, 0 }
   0xd   : > { %s488_s17 = scalar_select %p394_p6, 1, 0 }
   0xe   : > { %p484_p9 = scmp.eq.s32.totalorder %s373_s10, 0  ;;  %p401_p10 = pnand %p185_p7, %p67_p8 }
   0xf   : > { %s340_s19 = smov [#allocation2]   ;;  %s244_s24 = scalar_lea.hbm %s482_s0, 128 }
  0x10   : > { %s489_s18 = scalar_select %p401_p10, 1, 0 }
  0x11   : > { %s80_s20 = sshll.u32 %s340_s19, 4  ;;  %p200_p11 = pneg %p401_p10  ;;  %s81_s20 = int_to_ptr.vmem [resolvable:$true] %s80_s20 }
  0x12   : > { %p245_p13 = scmp.ne.s32.totalorder %s482_s0, %s244_s24  ;;  %p251_p3 = scmp.lt.u32.totalorder %s244_s24, %s482_s0 }
  0x13   : > { %p409_p12 = pnand %p484_p9, %p200_p11 }
  0x15   : > { %p246_p0 = pneg %p409_p12 }
  0x17   : > { %p247_p1 = pnand %p246_p0, %p245_p13 }
  0x19   : > { %p248_p2 = pneg %p247_p1 }
  0x1b   : > { %p253_p4 = pnand %p251_p3, %p248_p2 }
  0x1d   : > { %256 = shalt.err (!%p253_p4)
}
  0x1e   : > { %s257_s29 = scalar_lea.vmem %s81_s20, 128  ;;  %p265_p9 = scmp.lt.s32.totalorder %s81_s20, %s81_s20 }
  0x1f   : > { %p258_p7 = scmp.ne.s32.totalorder %s81_s20, %s257_s29  ;;  %p266_p6 = scmp.lt.s32.totalorder %s257_s29, %s257_s29 }
  0x21   : > { %p260_p8 = pnand %p258_p7, %p246_p0  ;;  %p267_p5 = por %p266_p6, %p265_p9 }
  0x23   : > { %p261_p11 = pneg %p260_p8 }
  0x25   : > { %p268_p10 = pnand %p267_p5, %p261_p11 }
  0x27   : > { %271 = shalt.err (!%p268_p10)
}
  0x28   : > { %203 = dma.hbm_to_vmem [thread:$0]  (!%p409_p12), %s482_s0, 128, %s81_s20, [#allocation3]  }
  0x29   : > { %p491_p13 = scmp.ne.s32.totalorder %s489_s18, 0 }
  0x2a   : > { %p492_p1 = scmp.eq.s32.totalorder (!%p491_p13), %s373_s10, 0 }
  0x2b   : > { %93 = sbr.rel (%p491_p13) target bundleno = 77 (0x4d), region = 24 }
  0x32   : > { %317 = dma.done.wait (%p492_p1), [#allocation3], 128   ;;  %p493_p0 = pmov %p492_p1 }
  0x33   : > { %s105_s3 = sand.u32 1, %s330_s7   ;;  %s191_s13 = sshll.u32 %s373_s10, 7  ;;  %v108_v0 = vld [vmem:[#allocation2] sm:$0xff] }
  0x34   : > { %319 = vsyncadd (%p493_p0), [#allocation3], 4294967168  ;;  %s189_s4 = sshll.u32 %s105_s3, 3  ;;  %v109_v1 = vadd.f32 1.0, %v108_v0  ;;  %s442_s19 = scalar_lea.hbm %s483_s1, %s191_s13 }
  0x35   : > { %s107_s5 = scalar_lea.vmem [#allocation5], %s189_s4  ;;  %s112_s20 = scalar_lea.sflag [#allocation4], %s105_s3 }
  0x36   : > { %s125_s11 = sshll.u32 %s107_s5, 4  ;;  %110 = vst [vmem:[%s107_s5] sm:$0xff] %v109_v1  ;;  %p494_p6 = scmp.ne.s32.totalorder %s487_s16, 0  ;;  %s437_s11 = int_to_ptr.vmem [resolvable:$true] %s125_s11 }
  0x37   : > { %s272_s21 = scalar_lea.vmem %s437_s11, 128  ;;  %s341_s10 = smov [#allocation5]  }
  0x38   : > { %p273_p5 = scmp.ne.s32.totalorder %s437_s11, %s272_s21  ;;  %s276_s22 = sshll.u32 %s341_s10, 4  ;;  %s277_s22 = int_to_ptr.vmem [resolvable:$false] %s276_s22 }
  0x39   : > { %s278_s23 = scalar_lea.vmem %s277_s22, 256  ;;  %p279_p12 = scmp.lt.s32.totalorder %s437_s11, %s277_s22 }
  0x3a   : > { %p274_p9 = pnand %p273_p5, %p494_p6  ;;  %p280_p2 = scmp.lt.s32.totalorder %s278_s23, %s272_s21 }
  0x3c   : > { %p275_p10 = pneg %p274_p9  ;;  %p281_p3 = por %p280_p2, %p279_p12 }
  0x3e   : > { %p282_p4 = pnand %p281_p3, %p275_p10 }
  0x40   : > { %285 = shalt.err (!%p282_p4)
}
  0x41   : > { %s286_s24 = scalar_lea.hbm %s442_s19, 128  ;;  %s290_s27 = scalar_lea.hbm %s483_s1, 256 }
  0x42   : > { %p287_p7 = scmp.ne.s32.totalorder %s442_s19, %s286_s24  ;;  %p291_p13 = scmp.lt.u32.totalorder %s442_s19, %s483_s1 }
  0x43   : > { %p292_p1 = scmp.lt.u32.totalorder %s290_s27, %s286_s24  ;;  %p294_p5 = scmp.lt.u32.totalorder %s286_s24, %s442_s19 }
  0x44   : > { %p288_p8 = pnand %p287_p7, %p494_p6 }
  0x45   : > { %p293_p0 = por %p292_p1, %p291_p13 }
  0x46   : > { %p289_p11 = pneg %p288_p8 }
  0x47   : > { %p295_p9 = por %p294_p5, %p293_p0 }
  0x49   : > { %p296_p10 = pnand %p295_p9, %p289_p11 }
  0x4b   : > { %299 = shalt.err (!%p296_p10)
}
  0x4c   : > { %198 = dma.vmem_to_hbm [thread:$0]  (%p494_p6), %s437_s11, 128, %s442_s19, %s112_s20  }
  0x4d PF: > { %p210_p12 = scmp.ge.s32.totalorder %s338_s9, 2  ;;  %s137_s30 = sand.u32 1, %s326_s6  }
  0x4e   : > { %p495_p2 = scmp.ne.s32.totalorder %s488_s17, 0  ;;  %s138_s2 = scalar_lea.sflag [#allocation4], %s137_s30 }
  0x50   : > { %p205_p3 = pnand %p210_p12, %p495_p2 }
  0x52   : > { %321 = dma.done.wait (!%p205_p3), %s138_s2, 128  }
  0x53   : > { %323 = vsyncadd (!%p205_p3), %s138_s2, 4294967168  ;;  %p12_p4 = scmp.ge.s32.totalorder %s377_s12, 4   ;;  %s496_s6 = smov %s330_s7 }
  0x54   : > { %s497_s7 = smov %s334_s8  ;;  %s498_s8 = smov %s388_s15 }
  0x55   : > { %s499_s9 = smov %s377_s12  ;;  %14 = sbr.rel (!%p12_p4) target bundleno = 4 (0x4), region = 61 }
  0x5c   :  { %143 = vsyncpa [#allocation3], 1 }
  0x5d   :  { %145 = vsyncpa [#allocation3 + $0x1], 1 }
  0x5e   :  { %146 = vsyncpa [#allocation4], 1 }
  0x5f   :  { %148 = vsyncpa [#allocation4 + $0x1], 1 }

// kernel: tpu_custom_call.1
= control target key start
LH: loop header
LB: loop body
LE: loop exit
PB: predicated region body
PF: predicated region fallthrough
CT: control target
= control target key end

     0   :  { %v2889_v2 = vmov 0   ;;  %s3825_s0 = inlined_call_operand.vmem [shape: f32[128,32], index: 0, kind: input, shape index: {}]   ;;  %s3826_s1 = inlined_call_operand.vmem [shape: s32[512,1], index: 1, kind: input, shape index: {}]   ;;  %s3827_s2 = inlined_call_operand.vmem [shape: s32[512,1], index: 2, kind: input, shape index: {}]   ;;  %s3828_s3 = inlined_call_operand.hbm [shape: f32[1,512], index: 3, kind: output, shape index: {}]  }
   0x1   :  { %v32_v0 = vld [vmem:[%s3826_s1 + $0x8] sm:$0xff]  ;;  %v31_v1 = vld [vmem:[%s3826_s1] sm:$0xff]  ;;  %2864 = vset.pattern.permute.xlu1 %v2889_v2  ;;  %2863 = vset.pattern.permute.xlu0 %v2889_v2  ;;  %v804_v5 = vld [vmem:[%s3827_s2 + $0x10] sm:$0xff] }
   0x2   :  { %101 = vperm.xlu1 %2864, %v32_v0   ;;  %98 = vperm.xlu0 %2863, %v31_v1   ;;  %v803_v3 = vld [vmem:[%s3827_s2 + $0x8] sm:$0xff]  ;;  %v802_v4 = vld [vmem:[%s3827_s2] sm:$0xff]  ;;  %v33_v6 = vld [vmem:[%s3826_s1 + $0x10] sm:$0xff] }
   0x3   :  { %v805_v7 = vld [vmem:[%s3827_s2 + $0x18] sm:$0xff]  ;;  %v806_v9 = vld [vmem:[%s3827_s2 + $0x20] sm:$0xff]  ;;  %v16_v12 = vld [vmem:[%s3825_s0 + $0x8] sm:$0xff] }
   0x4   :  { %v34_v8 = vld [vmem:[%s3826_s1 + $0x18] sm:$0xff]  ;;  %v35_v10 = vld [vmem:[%s3826_s1 + $0x20] sm:$0xff]  ;;  %v17_v14 = vld [vmem:[%s3825_s0 + $0x10] sm:$0xff] }
   0x5   :  { %v15_v11 = vld [vmem:[%s3825_s0] sm:$0xff]  ;;  %v18_v15 = vld [vmem:[%s3825_s0 + $0x18] sm:$0xff]  ;;  %v807_v16 = vld [vmem:[%s3827_s2 + $0x28] sm:$0xff] }
   0x6   :  { %870 = vperm.xlu1 %2864, %v803_v3   ;;  %867 = vperm.xlu0 %2863, %v802_v4   ;;  %v2699_v13 = vpack.c.bf16 %v16_v12, %v15_v11  ;;  %v36_v17 = vld [vmem:[%s3826_s1 + $0x28] sm:$0xff]  ;;  %v2703_v18 = vpack.c.bf16 %v18_v15, %v17_v14  ;;  %v19_v19 = vld [vmem:[%s3825_s0 + $0x20] sm:$0xff]  ;;  %v808_v21 = vld [vmem:[%s3827_s2 + $0x30] sm:$0xff] }
   0x7   :  { %v20_v20 = vld [vmem:[%s3825_s0 + $0x28] sm:$0xff]  ;;  %v37_v22 = vld [vmem:[%s3826_s1 + $0x30] sm:$0xff]  ;;  %v22_v25 = vld [vmem:[%s3825_s0 + $0x38] sm:$0xff] }
   0x8   :  { %2700 = vmatprep.subr.bf16.mxu0 %v2699_v13  ;;  %2732 = vmatprep.subr.bf16.mxu1 %v2699_v13  ;;  %v2707_v23 = vpack.c.bf16 %v20_v20, %v19_v19  ;;  %v21_v24 = vld [vmem:[%s3825_s0 + $0x30] sm:$0xff]  ;;  %v809_v26 = vld [vmem:[%s3827_s2 + $0x38] sm:$0xff]  ;;  %v23_v29 = vld [vmem:[%s3825_s0 + $0x40] sm:$0xff] }
   0x9   :  { %2702 = vmatpush3.bf16.msra.mxu0 %v2699_v13  ;;  %2734 = vmatpush3.bf16.msra.mxu1 %v2699_v13  ;;  %v38_v27 = vld [vmem:[%s3826_s1 + $0x38] sm:$0xff]  ;;  %v2711_v28 = vpack.c.bf16 %v22_v25, %v21_v24  ;;  %v24_v30 = vld [vmem:[%s3825_s0 + $0x48] sm:$0xff]  ;;  %v810_v31 = vld [vmem:[%s3827_s2 + $0x40] sm:$0xff] }
   0xa   :  { %873 = vperm.xlu1 %2864, %v804_v5   ;;  %104 = vperm.xlu0 %2863, %v33_v6   ;;  %v39_v32 = vld [vmem:[%s3826_s1 + $0x40] sm:$0xff]  ;;  %v2715_v33 = vpack.c.bf16 %v24_v30, %v23_v29  ;;  %v25_v34 = vld [vmem:[%s3825_s0 + $0x50] sm:$0xff]  ;;  %v26_v35 = vld [vmem:[%s3825_s0 + $0x58] sm:$0xff] }
   0xb   :  { %2704 = vmatprep.subr.bf16.mxu0 %v2703_v18  ;;  %2736 = vmatprep.subr.bf16.mxu1 %v2703_v18 }
   0xd   :  { %2706 = vmatpush3.bf16.msra.mxu0 %v2703_v18  ;;  %2738 = vmatpush3.bf16.msra.mxu1 %v2703_v18 }
   0xe   :  { %876 = vperm.xlu1 %2864, %v805_v7   ;;  %107 = vperm.xlu0 %2863, %v34_v8  }
   0xf   :  { %2708 = vmatprep.subr.bf16.mxu0 %v2707_v23  ;;  %2740 = vmatprep.subr.bf16.mxu1 %v2707_v23 }
  0x11   :  { %2710 = vmatpush3.bf16.msra.mxu0 %v2707_v23  ;;  %2742 = vmatpush3.bf16.msra.mxu1 %v2707_v23 }
  0x12   :  { %879 = vperm.xlu1 %2864, %v806_v9   ;;  %110 = vperm.xlu0 %2863, %v35_v10  }
  0x13   :  { %2712 = vmatprep.subr.bf16.mxu0 %v2711_v28  ;;  %2744 = vmatprep.subr.bf16.mxu1 %v2711_v28 }
  0x16   :  { %882 = vperm.xlu1 %2864, %v807_v16   ;;  %113 = vperm.xlu0 %2863, %v36_v17  }
  0x1a   :  { %885 = vperm.xlu1 %2864, %v808_v21   ;;  %116 = vperm.xlu0 %2863, %v37_v22  }
  0x1e   :  { %888 = vperm.xlu1 %2864, %v809_v26   ;;  %119 = vperm.xlu0 %2863, %v38_v27  }
  0x1f   :  { %8 = vsyncpa [#allocation3], 0  ;;  %2714 = vmatpush3.bf16.msra.mxu0 %v2711_v28  ;;  %2746 = vmatpush3.bf16.msra.mxu1 %v2711_v28  ;;  %v811_v36 = vld [vmem:[%s3827_s2 + $0x48] sm:$0xff]  ;;  %v2719_v38 = vpack.c.bf16 %v26_v35, %v25_v34  ;;  %v27_v39 = vld [vmem:[%s3825_s0 + $0x60] sm:$0xff]  ;;  %v95_v23 = vlaneseq }
  0x20   :  { %v40_v37 = vld [vmem:[%s3826_s1 + $0x48] sm:$0xff]  ;;  %2716 = vmatprep.subr.bf16.mxu0 %v2715_v33  ;;  %2748 = vmatprep.subr.bf16.mxu1 %v2715_v33  ;;  %v812_v41 = vld [vmem:[%s3827_s2 + $0x50] sm:$0xff]  ;;  %v30_v45 = vld [vmem:[%s3825_s0 + $0x78] sm:$0xff] }
  0x21   :  { %v28_v40 = vld [vmem:[%s3825_s0 + $0x68] sm:$0xff]  ;;  %v41_v42 = vld [vmem:[%s3826_s1 + $0x50] sm:$0xff]  ;;  %v813_v46 = vld [vmem:[%s3827_s2 + $0x58] sm:$0xff]  ;;  %v3154_v26 = vand.u32 127, %v95_v23 }
  0x22   :  { %891 = vperm.xlu1 %2864, %v810_v31   ;;  %122 = vperm.xlu0 %2863, %v39_v32   ;;  %v2723_v43 = vpack.c.bf16 %v28_v40, %v27_v39  ;;  %v29_v44 = vld [vmem:[%s3825_s0 + $0x70] sm:$0xff]  ;;  %v42_v47 = vld [vmem:[%s3826_s1 + $0x58] sm:$0xff]  ;;  %v814_v49 = vld [vmem:[%s3827_s2 + $0x60] sm:$0xff]  ;;  %v2890_v31 = vmov 1.0  }
  0x23   :  { %2718 = vmatpush3.bf16.msra.mxu0 %v2715_v33  ;;  %2750 = vmatpush3.bf16.msra.mxu1 %v2715_v33  ;;  %v2727_v48 = vpack.c.bf16 %v30_v45, %v29_v44  ;;  %v43_v50 = vld [vmem:[%s3826_s1 + $0x60] sm:$0xff]  ;;  %v815_v51 = vld [vmem:[%s3827_s2 + $0x68] sm:$0xff]  ;;  %v816_v53 = vld [vmem:[%s3827_s2 + $0x70] sm:$0xff] }
  0x24   :  { %2720 = vmatprep.subr.bf16.mxu0 %v2719_v38  ;;  %2752 = vmatprep.subr.bf16.mxu1 %v2719_v38  ;;  %v44_v52 = vld [vmem:[%s3826_s1 + $0x68] sm:$0xff]  ;;  %v45_v54 = vld [vmem:[%s3826_s1 + $0x70] sm:$0xff]  ;;  %v817_v55 = vld [vmem:[%s3827_s2 + $0x78] sm:$0xff] }
  0x25   :  { %v46_v56 = vld [vmem:[%s3826_s1 + $0x78] sm:$0xff]  ;;  %v818_v57 = vld [vmem:[%s3827_s2 + $0x80] sm:$0xff]  ;;  %v819_v59 = vld [vmem:[%s3827_s2 + $0x88] sm:$0xff] }
  0x26   :  { %894 = vperm.xlu1 %2864, %v811_v36   ;;  %125 = vperm.xlu0 %2863, %v40_v37   ;;  %v47_v58 = vld [vmem:[%s3826_s1 + $0x80] sm:$0xff]  ;;  %v48_v60 = vld [vmem:[%s3826_s1 + $0x88] sm:$0xff]  ;;  %v820_v61 = vld [vmem:[%s3827_s2 + $0x90] sm:$0xff] }
  0x27   :  { %2722 = vmatpush3.bf16.msra.mxu0 %v2719_v38  ;;  %2754 = vmatpush3.bf16.msra.mxu1 %v2719_v38  ;;  %v49_v62 = vld [vmem:[%s3826_s1 + $0x90] sm:$0xff]  ;;  %v821_v63 = vld [vmem:[%s3827_s2 + $0x98] sm:$0xff]  ;;  %v822_v1 = vld [vmem:[%s3827_s2 + $0xa0] sm:$0xff] }
  0x28   :  { %2724 = vmatprep.subr.bf16.mxu0 %v2723_v43  ;;  %2756 = vmatprep.subr.bf16.mxu1 %v2723_v43  ;;  %v50_v0 = vld [vmem:[%s3826_s1 + $0x98] sm:$0xff]  ;;  %v51_v2 = vld [vmem:[%s3826_s1 + $0xa0] sm:$0xff]  ;;  %v823_v3 = vld [vmem:[%s3827_s2 + $0xa8] sm:$0xff] }
  0x29   :  { %v52_v4 = vld [vmem:[%s3826_s1 + $0xa8] sm:$0xff]  ;;  %v824_v5 = vld [vmem:[%s3827_s2 + $0xb0] sm:$0xff]  ;;  %v825_v7 = vld [vmem:[%s3827_s2 + $0xb8] sm:$0xff] }
  0x2a   :  { %897 = vperm.xlu1 %2864, %v812_v41   ;;  %128 = vperm.xlu0 %2863, %v41_v42   ;;  %v53_v6 = vld [vmem:[%s3826_s1 + $0xb0] sm:$0xff]  ;;  %v54_v8 = vld [vmem:[%s3826_s1 + $0xb8] sm:$0xff]  ;;  %v826_v9 = vld [vmem:[%s3827_s2 + $0xc0] sm:$0xff] }
  0x2b   :  { %2726 = vmatpush3.bf16.msra.mxu0 %v2723_v43  ;;  %2758 = vmatpush3.bf16.msra.mxu1 %v2723_v43  ;;  %v55_v10 = vld [vmem:[%s3826_s1 + $0xc0] sm:$0xff]  ;;  %v827_v11 = vld [vmem:[%s3827_s2 + $0xc8] sm:$0xff]  ;;  %v828_v13 = vld [vmem:[%s3827_s2 + $0xd0] sm:$0xff] }
  0x2c   :  { %2728 = vmatprep.subr.bf16.mxu0 %v2727_v48  ;;  %2760 = vmatprep.subr.bf16.mxu1 %v2727_v48  ;;  %v56_v12 = vld [vmem:[%s3826_s1 + $0xc8] sm:$0xff]  ;;  %v57_v14 = vld [vmem:[%s3826_s1 + $0xd0] sm:$0xff]  ;;  %v829_v15 = vld [vmem:[%s3827_s2 + $0xd8] sm:$0xff] }
  0x2d   :  { %v58_v16 = vld [vmem:[%s3826_s1 + $0xd8] sm:$0xff]  ;;  %v830_v17 = vld [vmem:[%s3827_s2 + $0xe0] sm:$0xff]  ;;  %v831_v19 = vld [vmem:[%s3827_s2 + $0xe8] sm:$0xff] }
  0x2e   :  { %900 = vperm.xlu1 %2864, %v813_v46   ;;  %131 = vperm.xlu0 %2863, %v42_v47   ;;  %v59_v18 = vld [vmem:[%s3826_s1 + $0xe0] sm:$0xff]  ;;  %v60_v20 = vld [vmem:[%s3826_s1 + $0xe8] sm:$0xff]  ;;  %v832_v21 = vld [vmem:[%s3827_s2 + $0xf0] sm:$0xff] }
  0x2f   :  { %2730 = vmatpush3.bf16.msra.mxu0 %v2727_v48  ;;  %2762 = vmatpush3.bf16.msra.mxu1 %v2727_v48  ;;  %v61_v22 = vld [vmem:[%s3826_s1 + $0xf0] sm:$0xff]  ;;  %v833_v24 = vld [vmem:[%s3827_s2 + $0xf8] sm:$0xff]  ;;  %v834_v27 = vld [vmem:[%s3827_s2 + $0x100] sm:$0xff] }
  0x30   :  { %v62_v25 = vld [vmem:[%s3826_s1 + $0xf8] sm:$0xff]  ;;  %v63_v28 = vld [vmem:[%s3826_s1 + $0x100] sm:$0xff]  ;;  %v835_v32 = vld [vmem:[%s3827_s2 + $0x108] sm:$0xff] }
  0x31   :  { %v64_v33 = vld [vmem:[%s3826_s1 + $0x108] sm:$0xff]  ;;  %v836_v36 = vld [vmem:[%s3827_s2 + $0x110] sm:$0xff]  ;;  %v837_v40 = vld [vmem:[%s3827_s2 + $0x118] sm:$0xff] }
  0x32   :  { %903 = vperm.xlu1 %2864, %v814_v49   ;;  %134 = vperm.xlu0 %2863, %v43_v50   ;;  %v65_v37 = vld [vmem:[%s3826_s1 + $0x110] sm:$0xff]  ;;  %v66_v41 = vld [vmem:[%s3826_s1 + $0x118] sm:$0xff]  ;;  %v838_v44 = vld [vmem:[%s3827_s2 + $0x120] sm:$0xff] }
  0x33   :  { %v67_v45 = vld [vmem:[%s3826_s1 + $0x120] sm:$0xff]  ;;  %v839_v48 = vld [vmem:[%s3827_s2 + $0x128] sm:$0xff] }
  0x34   :  { %v68_v49 = vld [vmem:[%s3826_s1 + $0x128] sm:$0xff] }
  0x36   :  { %906 = vperm.xlu1 %2864, %v815_v51   ;;  %137 = vperm.xlu0 %2863, %v44_v52   ;;  %v840_v52 = vld [vmem:[%s3827_s2 + $0x130] sm:$0xff] }
  0x3a   :  { %909 = vperm.xlu1 %2864, %v816_v53   ;;  %140 = vperm.xlu0 %2863, %v45_v54   ;;  %v69_v53 = vld [vmem:[%s3826_s1 + $0x130] sm:$0xff] }
  0x3e   :  { %912 = vperm.xlu1 %2864, %v817_v55   ;;  %143 = vperm.xlu0 %2863, %v46_v56   ;;  %v841_v56 = vld [vmem:[%s3827_s2 + $0x138] sm:$0xff] }
  0x42   :  { %915 = vperm.xlu1 %2864, %v818_v57   ;;  %146 = vperm.xlu0 %2863, %v47_v58   ;;  %v70_v57 = vld [vmem:[%s3826_s1 + $0x138] sm:$0xff] }
  0x46   :  { %918 = vperm.xlu1 %2864, %v819_v59   ;;  %149 = vperm.xlu0 %2863, %v48_v60   ;;  %v842_v60 = vld [vmem:[%s3827_s2 + $0x140] sm:$0xff] }
  0x4a   :  { %921 = vperm.xlu1 %2864, %v820_v61   ;;  %152 = vperm.xlu0 %2863, %v49_v62   ;;  %v71_v61 = vld [vmem:[%s3826_s1 + $0x140] sm:$0xff] }
  0x4e   :  { %924 = vperm.xlu1 %2864, %v821_v63   ;;  %155 = vperm.xlu0 %2863, %v50_v0   ;;  %v843_v0 = vld [vmem:[%s3827_s2 + $0x148] sm:$0xff] }
  0x52   :  { %927 = vperm.xlu1 %2864, %v822_v1   ;;  %158 = vperm.xlu0 %2863, %v51_v2   ;;  %v72_v1 = vld [vmem:[%s3826_s1 + $0x148] sm:$0xff] }
  0x56   :  { %930 = vperm.xlu1 %2864, %v823_v3   ;;  %161 = vperm.xlu0 %2863, %v52_v4   ;;  %v844_v4 = vld [vmem:[%s3827_s2 + $0x150] sm:$0xff] }
  0x5a   :  { %933 = vperm.xlu1 %2864, %v824_v5   ;;  %164 = vperm.xlu0 %2863, %v53_v6   ;;  %v73_v5 = vld [vmem:[%s3826_s1 + $0x150] sm:$0xff] }
  0x5e   :  { %936 = vperm.xlu1 %2864, %v825_v7   ;;  %167 = vperm.xlu0 %2863, %v54_v8   ;;  %v845_v8 = vld [vmem:[%s3827_s2 + $0x158] sm:$0xff] }
  0x62   :  { %939 = vperm.xlu1 %2864, %v826_v9   ;;  %170 = vperm.xlu0 %2863, %v55_v10   ;;  %v74_v9 = vld [vmem:[%s3826_s1 + $0x158] sm:$0xff] }
  0x66   :  { %942 = vperm.xlu1 %2864, %v827_v11   ;;  %173 = vperm.xlu0 %2863, %v56_v12   ;;  %v846_v12 = vld [vmem:[%s3827_s2 + $0x160] sm:$0xff] }
  0x6a   :  { %945 = vperm.xlu1 %2864, %v828_v13   ;;  %176 = vperm.xlu0 %2863, %v57_v14   ;;  %v75_v13 = vld [vmem:[%s3826_s1 + $0x160] sm:$0xff] }
  0x6e   :  { %948 = vperm.xlu1 %2864, %v829_v15   ;;  %179 = vperm.xlu0 %2863, %v58_v16   ;;  %v847_v16 = vld [vmem:[%s3827_s2 + $0x168] sm:$0xff] }
  0x72   :  { %951 = vperm.xlu1 %2864, %v830_v17   ;;  %182 = vperm.xlu0 %2863, %v59_v18   ;;  %v76_v17 = vld [vmem:[%s3826_s1 + $0x168] sm:$0xff] }
  0x76   :  { %954 = vperm.xlu1 %2864, %v831_v19   ;;  %185 = vperm.xlu0 %2863, %v60_v20   ;;  %v848_v20 = vld [vmem:[%s3827_s2 + $0x170] sm:$0xff] }
  0x7a   :  { %957 = vperm.xlu1 %2864, %v832_v21   ;;  %188 = vperm.xlu0 %2863, %v61_v22   ;;  %v77_v21 = vld [vmem:[%s3826_s1 + $0x170] sm:$0xff] }
  0x7e   :  { %960 = vperm.xlu1 %2864, %v833_v24   ;;  %191 = vperm.xlu0 %2863, %v62_v25   ;;  %v849_v25 = vld [vmem:[%s3827_s2 + $0x178] sm:$0xff] }
  0x81   :  { %v102_v29 = vpop.permute.xlu1 %101  ;;  %v99_v30 = vpop.permute.xlu0 %98 }
  0x82   :  { %vm290_vm0 = vcmp.eq.s32.totalorder %v102_v29, %v3154_v26  ;;  %963 = vperm.xlu1 %2864, %v834_v27   ;;  %194 = vperm.xlu0 %2863, %v63_v28   ;;  %vm289_vm1 = vcmp.eq.s32.totalorder %v99_v30, %v3154_v26  ;;  %v78_v27 = vld [vmem:[%s3826_s1 + $0x178] sm:$0xff]  ;;  %v850_v30 = vld [vmem:[%s3827_s2 + $0x180] sm:$0xff] }
  0x83   :  { %2475 = vmatprep.mubr.msk.f32.mxu0 %vm289_vm1, %v2890_v31 }
  0x84   :  { %2476 = vmatmul.mubr.msk.f32.vlgmr.msra.gmra.mrb[0].mxu0 %vm290_vm0, %v2890_v31 }
  0x85   :  { %v871_v34 = vpop.permute.xlu1 %870  ;;  %v868_v35 = vpop.permute.xlu0 %867 }
  0x86   :  { %vm1059_vm2 = vcmp.eq.s32.totalorder %v871_v34, %v3154_v26  ;;  %966 = vperm.xlu1 %2864, %v835_v32   ;;  %197 = vperm.xlu0 %2863, %v64_v33   ;;  %vm1058_vm3 = vcmp.eq.s32.totalorder %v868_v35, %v3154_v26  ;;  %v79_v32 = vld [vmem:[%s3826_s1 + $0x180] sm:$0xff]  ;;  %v851_v35 = vld [vmem:[%s3827_s2 + $0x188] sm:$0xff] }
  0x87   :  { %2603 = vmatprep.mubr.msk.f32.mxu1 %vm1058_vm3, %v2890_v31 }
  0x88   :  { %2604 = vmatmul.mubr.msk.f32.vlgmr.msra.gmra.mrb[0].mxu1 %vm1059_vm2, %v2890_v31 }
  0x89   :  { %v874_v38 = vpop.permute.xlu1 %873  ;;  %v105_v39 = vpop.permute.xlu0 %104 }
  0x8a   :  { %vm1060_vm4 = vcmp.eq.s32.totalorder %v874_v38, %v3154_v26  ;;  %vm291_vm5 = vcmp.eq.s32.totalorder %v105_v39, %v3154_v26  ;;  %969 = vperm.xlu1 %2864, %v836_v36   ;;  %200 = vperm.xlu0 %2863, %v65_v37   ;;  %v80_v36 = vld [vmem:[%s3826_s1 + $0x188] sm:$0xff]  ;;  %v852_v39 = vld [vmem:[%s3827_s2 + $0x190] sm:$0xff] }
  0x8b   :  { %2478 = vmatprep.mubr.msk.f32.mxu0 %vm291_vm5, %v2890_v31  ;;  %2606 = vmatprep.mubr.msk.f32.mxu1 %vm1060_vm4, %v2890_v31 }
  0x8d   :  { %v877_v42 = vpop.permute.xlu1 %876  ;;  %v108_v43 = vpop.permute.xlu0 %107 }
  0x8e   :  { %vm1061_vm6 = vcmp.eq.s32.totalorder %v877_v42, %v3154_v26  ;;  %vm292_vm7 = vcmp.eq.s32.totalorder %v108_v43, %v3154_v26  ;;  %972 = vperm.xlu1 %2864, %v837_v40   ;;  %203 = vperm.xlu0 %2863, %v66_v41   ;;  %v81_v40 = vld [vmem:[%s3826_s1 + $0x190] sm:$0xff]  ;;  %v853_v43 = vld [vmem:[%s3827_s2 + $0x198] sm:$0xff] }
  0x8f   :  { %2479 = vmatmul.mubr.msk.f32.gmra.mrb[2].mxu0 %vm292_vm7, %v2890_v31  ;;  %2607 = vmatmul.mubr.msk.f32.gmra.mrb[2].mxu1 %vm1061_vm6, %v2890_v31 }
  0x91   :  { %v880_v46 = vpop.permute.xlu1 %879  ;;  %v111_v47 = vpop.permute.xlu0 %110 }
  0x92   :  { %vm1062_vm8 = vcmp.eq.s32.totalorder %v880_v46, %v3154_v26  ;;  %vm293_vm9 = vcmp.eq.s32.totalorder %v111_v47, %v3154_v26  ;;  %975 = vperm.xlu1 %2864, %v838_v44   ;;  %206 = vperm.xlu0 %2863, %v67_v45   ;;  %v82_v44 = vld [vmem:[%s3826_s1 + $0x198] sm:$0xff]  ;;  %v854_v47 = vld [vmem:[%s3827_s2 + $0x1a0] sm:$0xff] }
  0x93   :  { %2481 = vmatprep.mubr.msk.f32.mxu0 %vm293_vm9, %v2890_v31  ;;  %2609 = vmatprep.mubr.msk.f32.mxu1 %vm1062_vm8, %v2890_v31 }
  0x95   :  { %v883_v50 = vpop.permute.xlu1 %882  ;;  %v114_v51 = vpop.permute.xlu0 %113 }
  0x96   :  { %vm1063_vm10 = vcmp.eq.s32.totalorder %v883_v50, %v3154_v26  ;;  %vm294_vm11 = vcmp.eq.s32.totalorder %v114_v51, %v3154_v26  ;;  %978 = vperm.xlu1 %2864, %v839_v48   ;;  %209 = vperm.xlu0 %2863, %v68_v49   ;;  %v83_v48 = vld [vmem:[%s3826_s1 + $0x1a0] sm:$0xff]  ;;  %v855_v51 = vld [vmem:[%s3827_s2 + $0x1a8] sm:$0xff] }
  0x97   :  { %2482 = vmatmul.mubr.msk.f32.gmra.mrb[4].mxu0 %vm294_vm11, %v2890_v31  ;;  %2610 = vmatmul.mubr.msk.f32.gmra.mrb[4].mxu1 %vm1063_vm10, %v2890_v31 }
  0x99   :  { %v886_v54 = vpop.permute.xlu1 %885  ;;  %v117_v55 = vpop.permute.xlu0 %116 }
  0x9a   :  { %vm1064_vm12 = vcmp.eq.s32.totalorder %v886_v54, %v3154_v26  ;;  %vm295_vm13 = vcmp.eq.s32.totalorder %v117_v55, %v3154_v26  ;;  %981 = vperm.xlu1 %2864, %v840_v52   ;;  %212 = vperm.xlu0 %2863, %v69_v53   ;;  %v84_v52 = vld [vmem:[%s3826_s1 + $0x1a8] sm:$0xff]  ;;  %v856_v55 = vld [vmem:[%s3827_s2 + $0x1b0] sm:$0xff] }
  0x9b   :  { %2484 = vmatprep.mubr.msk.f32.mxu0 %vm295_vm13, %v2890_v31  ;;  %2612 = vmatprep.mubr.msk.f32.mxu1 %vm1064_vm12, %v2890_v31 }
  0x9d   :  { %v889_v58 = vpop.permute.xlu1 %888  ;;  %v120_v59 = vpop.permute.xlu0 %119 }
  0x9e   :  { %vm1065_vm14 = vcmp.eq.s32.totalorder %v889_v58, %v3154_v26  ;;  %vm296_vm15 = vcmp.eq.s32.totalorder %v120_v59, %v3154_v26  ;;  %984 = vperm.xlu1 %2864, %v841_v56   ;;  %215 = vperm.xlu0 %2863, %v70_v57   ;;  %v85_v56 = vld [vmem:[%s3826_s1 + $0x1b0] sm:$0xff]  ;;  %v857_v59 = vld [vmem:[%s3827_s2 + $0x1b8] sm:$0xff] }
  0x9f   :  { %2485 = vmatmul.mubr.msk.f32.gmra.mrb[6].mxu0 %vm296_vm15, %v2890_v31  ;;  %2613 = vmatmul.mubr.msk.f32.gmra.mrb[6].mxu1 %vm1065_vm14, %v2890_v31 }
  0xa1   :  { %v892_v62 = vpop.permute.xlu1 %891  ;;  %v123_v63 = vpop.permute.xlu0 %122 }
  0xa2   :  { %vm1066_vm0 = vcmp.eq.s32.totalorder %v892_v62, %v3154_v26  ;;  %vm297_vm1 = vcmp.eq.s32.totalorder %v123_v63, %v3154_v26  ;;  %987 = vperm.xlu1 %2864, %v842_v60   ;;  %218 = vperm.xlu0 %2863, %v71_v61   ;;  %v86_v60 = vld [vmem:[%s3826_s1 + $0x1b8] sm:$0xff]  ;;  %v858_v63 = vld [vmem:[%s3827_s2 + $0x1c0] sm:$0xff] }
  0xa3   :  { %2487 = vmatprep.mubr.msk.f32.mxu0 %vm297_vm1, %v2890_v31  ;;  %2615 = vmatprep.mubr.msk.f32.mxu1 %vm1066_vm0, %v2890_v31 }
  0xa5   :  { %v895_v2 = vpop.permute.xlu1 %894  ;;  %v126_v3 = vpop.permute.xlu0 %125 }
  0xa6   :  { %vm1067_vm2 = vcmp.eq.s32.totalorder %v895_v2, %v3154_v26  ;;  %vm298_vm3 = vcmp.eq.s32.totalorder %v126_v3, %v3154_v26  ;;  %990 = vperm.xlu1 %2864, %v843_v0   ;;  %221 = vperm.xlu0 %2863, %v72_v1   ;;  %v87_v0 = vld [vmem:[%s3826_s1 + $0x1c0] sm:$0xff]  ;;  %v859_v3 = vld [vmem:[%s3827_s2 + $0x1c8] sm:$0xff] }
  0xa7   :  { %2488 = vmatmul.mubr.msk.f32.gmra.mrb[8].mxu0 %vm298_vm3, %v2890_v31  ;;  %2616 = vmatmul.mubr.msk.f32.gmra.mrb[8].mxu1 %vm1067_vm2, %v2890_v31 }
  0xa9   :  { %v898_v6 = vpop.permute.xlu1 %897  ;;  %v129_v7 = vpop.permute.xlu0 %128 }
  0xaa   :  { %vm1068_vm4 = vcmp.eq.s32.totalorder %v898_v6, %v3154_v26  ;;  %vm299_vm5 = vcmp.eq.s32.totalorder %v129_v7, %v3154_v26  ;;  %993 = vperm.xlu1 %2864, %v844_v4   ;;  %224 = vperm.xlu0 %2863, %v73_v5   ;;  %v88_v4 = vld [vmem:[%s3826_s1 + $0x1c8] sm:$0xff]  ;;  %v860_v7 = vld [vmem:[%s3827_s2 + $0x1d0] sm:$0xff] }
  0xab   :  { %2490 = vmatprep.mubr.msk.f32.mxu0 %vm299_vm5, %v2890_v31  ;;  %2618 = vmatprep.mubr.msk.f32.mxu1 %vm1068_vm4, %v2890_v31 }
  0xad   :  { %v901_v10 = vpop.permute.xlu1 %900  ;;  %v132_v11 = vpop.permute.xlu0 %131 }
  0xae   :  { %vm1069_vm6 = vcmp.eq.s32.totalorder %v901_v10, %v3154_v26  ;;  %vm300_vm7 = vcmp.eq.s32.totalorder %v132_v11, %v3154_v26  ;;  %996 = vperm.xlu1 %2864, %v845_v8   ;;  %227 = vperm.xlu0 %2863, %v74_v9   ;;  %v89_v8 = vld [vmem:[%s3826_s1 + $0x1d0] sm:$0xff]  ;;  %v861_v11 = vld [vmem:[%s3827_s2 + $0x1d8] sm:$0xff] }
  0xaf   :  { %2491 = vmatmul.mubr.msk.f32.gmra.mrb[10].mxu0 %vm300_vm7, %v2890_v31  ;;  %2619 = vmatmul.mubr.msk.f32.gmra.mrb[10].mxu1 %vm1069_vm6, %v2890_v31 }
  0xb1   :  { %v904_v14 = vpop.permute.xlu1 %903  ;;  %v135_v15 = vpop.permute.xlu0 %134 }
  0xb2   :  { %vm1070_vm8 = vcmp.eq.s32.totalorder %v904_v14, %v3154_v26  ;;  %vm301_vm9 = vcmp.eq.s32.totalorder %v135_v15, %v3154_v26  ;;  %999 = vperm.xlu1 %2864, %v846_v12   ;;  %230 = vperm.xlu0 %2863, %v75_v13   ;;  %v90_v12 = vld [vmem:[%s3826_s1 + $0x1d8] sm:$0xff]  ;;  %v862_v15 = vld [vmem:[%s3827_s2 + $0x1e0] sm:$0xff] }
  0xb3   :  { %2493 = vmatprep.mubr.msk.f32.mxu0 %vm301_vm9, %v2890_v31  ;;  %2621 = vmatprep.mubr.msk.f32.mxu1 %vm1070_vm8, %v2890_v31 }
  0xb5   :  { %v907_v18 = vpop.permute.xlu1 %906  ;;  %v138_v19 = vpop.permute.xlu0 %137 }
  0xb6   :  { %vm1071_vm10 = vcmp.eq.s32.totalorder %v907_v18, %v3154_v26  ;;  %vm302_vm11 = vcmp.eq.s32.totalorder %v138_v19, %v3154_v26  ;;  %1002 = vperm.xlu1 %2864, %v847_v16   ;;  %233 = vperm.xlu0 %2863, %v76_v17   ;;  %v91_v16 = vld [vmem:[%s3826_s1 + $0x1e0] sm:$0xff]  ;;  %v863_v19 = vld [vmem:[%s3827_s2 + $0x1e8] sm:$0xff] }
  0xb7   :  { %2494 = vmatmul.mubr.msk.f32.gmra.mrb[12].mxu0 %vm302_vm11, %v2890_v31  ;;  %2622 = vmatmul.mubr.msk.f32.gmra.mrb[12].mxu1 %vm1071_vm10, %v2890_v31 }
  0xb9   :  { %v910_v22 = vpop.permute.xlu1 %909  ;;  %v141_v24 = vpop.permute.xlu0 %140 }
  0xba   :  { %vm1072_vm12 = vcmp.eq.s32.totalorder %v910_v22, %v3154_v26  ;;  %vm303_vm13 = vcmp.eq.s32.totalorder %v141_v24, %v3154_v26  ;;  %1005 = vperm.xlu1 %2864, %v848_v20   ;;  %236 = vperm.xlu0 %2863, %v77_v21   ;;  %v92_v20 = vld [vmem:[%s3826_s1 + $0x1e8] sm:$0xff]  ;;  %v864_v24 = vld [vmem:[%s3827_s2 + $0x1f0] sm:$0xff] }
  0xbb   :  { %2496 = vmatprep.mubr.msk.f32.mxu0 %vm303_vm13, %v2890_v31  ;;  %2624 = vmatprep.mubr.msk.f32.mxu1 %vm1072_vm12, %v2890_v31 }
  0xbd   :  { %v913_v28 = vpop.permute.xlu1 %912  ;;  %v144_v29 = vpop.permute.xlu0 %143 }
  0xbe   :  { %vm1073_vm14 = vcmp.eq.s32.totalorder %v913_v28, %v3154_v26  ;;  %vm304_vm15 = vcmp.eq.s32.totalorder %v144_v29, %v3154_v26  ;;  %1008 = vperm.xlu1 %2864, %v849_v25   ;;  %239 = vperm.xlu0 %2863, %v78_v27   ;;  %v93_v25 = vld [vmem:[%s3826_s1 + $0x1f0] sm:$0xff]  ;;  %v865_v29 = vld [vmem:[%s3827_s2 + $0x1f8] sm:$0xff] }
  0xbf   :  { %2497 = vmatmul.mubr.msk.f32.gmra.mrb[14].mxu0 %vm304_vm15, %v2890_v31  ;;  %2625 = vmatmul.mubr.msk.f32.gmra.mrb[14].mxu1 %vm1073_vm14, %v2890_v31 }
  0xc1   :  { %v916_v33 = vpop.permute.xlu1 %915  ;;  %v147_v34 = vpop.permute.xlu0 %146 }
  0xc2   :  { %vm1074_vm0 = vcmp.eq.s32.totalorder %v916_v33, %v3154_v26  ;;  %vm305_vm1 = vcmp.eq.s32.totalorder %v147_v34, %v3154_v26  ;;  %1011 = vperm.xlu1 %2864, %v850_v30   ;;  %242 = vperm.xlu0 %2863, %v79_v32   ;;  %v94_v30 = vld [vmem:[%s3826_s1 + $0x1f8] sm:$0xff]  ;;  %s2892_s1 = smov [#allocation2]  }
  0xc3   :  { %2499 = vmatprep.mubr.msk.f32.mxu0 %vm305_vm1, %v2890_v31  ;;  %2627 = vmatprep.mubr.msk.f32.mxu1 %vm1074_vm0, %v2890_v31  ;;  %s2013_s2 = sshll.u32 %s2892_s1, 4  ;;  %s2014_s2 = int_to_ptr.vmem [resolvable:$true] %s2013_s2 }
  0xc4   :  { %s2865_s22 = scalar_lea.vmem %s2014_s2, 64  ;;  %p2870_p1 = scmp.lt.s32.totalorder %s2014_s2, %s2014_s2 }
  0xc5   :  { %v919_v37 = vpop.permute.xlu1 %918  ;;  %v150_v38 = vpop.permute.xlu0 %149  ;;  %p2866_p0 = scmp.ne.s32.totalorder %s2014_s2, %s2865_s22  ;;  %p2871_p2 = scmp.lt.s32.totalorder %s2865_s22, %s2865_s22 }
  0xc6   :  { %vm1075_vm2 = vcmp.eq.s32.totalorder %v919_v37, %v3154_v26  ;;  %vm306_vm3 = vcmp.eq.s32.totalorder %v150_v38, %v3154_v26  ;;  %1014 = vperm.xlu1 %2864, %v851_v35   ;;  %245 = vperm.xlu0 %2863, %v80_v36  }
  0xc7   :  { %2500 = vmatmul.mubr.msk.f32.gmra.mrb[16].mxu0 %vm306_vm3, %v2890_v31  ;;  %2628 = vmatmul.mubr.msk.f32.gmra.mrb[16].mxu1 %vm1075_vm2, %v2890_v31  ;;  %p2872_p3 = por %p2871_p2, %p2870_p1 }
  0xc9   :  { %v922_v41 = vpop.permute.xlu1 %921  ;;  %v153_v42 = vpop.permute.xlu0 %152  ;;  %p2873_p4 = pnand %p2872_p3, %p2866_p0 }
  0xca   :  { %vm1076_vm4 = vcmp.eq.s32.totalorder %v922_v41, %v3154_v26  ;;  %vm307_vm5 = vcmp.eq.s32.totalorder %v153_v42, %v3154_v26  ;;  %1017 = vperm.xlu1 %2864, %v852_v39   ;;  %248 = vperm.xlu0 %2863, %v81_v40  }
  0xcb   :  { %2502 = vmatprep.mubr.msk.f32.mxu0 %vm307_vm5, %v2890_v31  ;;  %2630 = vmatprep.mubr.msk.f32.mxu1 %vm1076_vm4, %v2890_v31 }
  0xcd   :  { %v925_v45 = vpop.permute.xlu1 %924  ;;  %v156_v46 = vpop.permute.xlu0 %155 }
  0xce   :  { %vm1077_vm6 = vcmp.eq.s32.totalorder %v925_v45, %v3154_v26  ;;  %vm308_vm7 = vcmp.eq.s32.totalorder %v156_v46, %v3154_v26  ;;  %1020 = vperm.xlu1 %2864, %v853_v43   ;;  %251 = vperm.xlu0 %2863, %v82_v44  }
  0xcf   :  { %2503 = vmatmul.mubr.msk.f32.gmra.mrb[18].mxu0 %vm308_vm7, %v2890_v31  ;;  %2631 = vmatmul.mubr.msk.f32.gmra.mrb[18].mxu1 %vm1077_vm6, %v2890_v31 }
  0xd1   :  { %v928_v49 = vpop.permute.xlu1 %927  ;;  %v159_v50 = vpop.permute.xlu0 %158 }
  0xd2   :  { %vm1078_vm8 = vcmp.eq.s32.totalorder %v928_v49, %v3154_v26  ;;  %vm309_vm9 = vcmp.eq.s32.totalorder %v159_v50, %v3154_v26  ;;  %1023 = vperm.xlu1 %2864, %v854_v47   ;;  %254 = vperm.xlu0 %2863, %v83_v48  }
  0xd3   :  { %2505 = vmatprep.mubr.msk.f32.mxu0 %vm309_vm9, %v2890_v31  ;;  %2633 = vmatprep.mubr.msk.f32.mxu1 %vm1078_vm8, %v2890_v31 }
  0xd5   :  { %v931_v53 = vpop.permute.xlu1 %930  ;;  %v162_v54 = vpop.permute.xlu0 %161 }
  0xd6   :  { %vm1079_vm10 = vcmp.eq.s32.totalorder %v931_v53, %v3154_v26  ;;  %vm310_vm11 = vcmp.eq.s32.totalorder %v162_v54, %v3154_v26  ;;  %1026 = vperm.xlu1 %2864, %v855_v51   ;;  %257 = vperm.xlu0 %2863, %v84_v52  }
  0xd7   :  { %2506 = vmatmul.mubr.msk.f32.gmra.mrb[20].mxu0 %vm310_vm11, %v2890_v31  ;;  %2634 = vmatmul.mubr.msk.f32.gmra.mrb[20].mxu1 %vm1079_vm10, %v2890_v31 }
  0xd9   :  { %v934_v57 = vpop.permute.xlu1 %933  ;;  %v165_v58 = vpop.permute.xlu0 %164 }
  0xda   :  { %vm1080_vm12 = vcmp.eq.s32.totalorder %v934_v57, %v3154_v26  ;;  %vm311_vm13 = vcmp.eq.s32.totalorder %v165_v58, %v3154_v26  ;;  %1029 = vperm.xlu1 %2864, %v856_v55   ;;  %260 = vperm.xlu0 %2863, %v85_v56  }
  0xdb   :  { %2508 = vmatprep.mubr.msk.f32.mxu0 %vm311_vm13, %v2890_v31  ;;  %2636 = vmatprep.mubr.msk.f32.mxu1 %vm1080_vm12, %v2890_v31 }
  0xdd   :  { %v937_v61 = vpop.permute.xlu1 %936  ;;  %v168_v62 = vpop.permute.xlu0 %167 }
  0xde   :  { %vm1081_vm14 = vcmp.eq.s32.totalorder %v937_v61, %v3154_v26  ;;  %vm312_vm15 = vcmp.eq.s32.totalorder %v168_v62, %v3154_v26  ;;  %1032 = vperm.xlu1 %2864, %v857_v59   ;;  %263 = vperm.xlu0 %2863, %v86_v60  }
  0xdf   :  { %2509 = vmatmul.mubr.msk.f32.gmra.mrb[22].mxu0 %vm312_vm15, %v2890_v31  ;;  %2637 = vmatmul.mubr.msk.f32.gmra.mrb[22].mxu1 %vm1081_vm14, %v2890_v31 }
  0xe1   :  { %v940_v1 = vpop.permute.xlu1 %939  ;;  %v171_v2 = vpop.permute.xlu0 %170 }
  0xe2   :  { %vm1082_vm0 = vcmp.eq.s32.totalorder %v940_v1, %v3154_v26  ;;  %vm313_vm1 = vcmp.eq.s32.totalorder %v171_v2, %v3154_v26  ;;  %1035 = vperm.xlu1 %2864, %v858_v63   ;;  %266 = vperm.xlu0 %2863, %v87_v0  }
  0xe3   :  { %2511 = vmatprep.mubr.msk.f32.mxu0 %vm313_vm1, %v2890_v31  ;;  %2639 = vmatprep.mubr.msk.f32.mxu1 %vm1082_vm0, %v2890_v31 }
  0xe5   :  { %v943_v5 = vpop.permute.xlu1 %942  ;;  %v174_v6 = vpop.permute.xlu0 %173 }
  0xe6   :  { %vm1083_vm2 = vcmp.eq.s32.totalorder %v943_v5, %v3154_v26  ;;  %vm314_vm3 = vcmp.eq.s32.totalorder %v174_v6, %v3154_v26  ;;  %1038 = vperm.xlu1 %2864, %v859_v3   ;;  %269 = vperm.xlu0 %2863, %v88_v4  }
  0xe7   :  { %2512 = vmatmul.mubr.msk.f32.gmra.mrb[24].mxu0 %vm314_vm3, %v2890_v31  ;;  %2640 = vmatmul.mubr.msk.f32.gmra.mrb[24].mxu1 %vm1083_vm2, %v2890_v31 }
  0xe9   :  { %v946_v9 = vpop.permute.xlu1 %945  ;;  %v177_v10 = vpop.permute.xlu0 %176 }
  0xea   :  { %vm1084_vm4 = vcmp.eq.s32.totalorder %v946_v9, %v3154_v26  ;;  %vm315_vm5 = vcmp.eq.s32.totalorder %v177_v10, %v3154_v26  ;;  %1041 = vperm.xlu1 %2864, %v860_v7   ;;  %272 = vperm.xlu0 %2863, %v89_v8  }
  0xeb   :  { %2514 = vmatprep.mubr.msk.f32.mxu0 %vm315_vm5, %v2890_v31  ;;  %2642 = vmatprep.mubr.msk.f32.mxu1 %vm1084_vm4, %v2890_v31 }
  0xed   :  { %v949_v13 = vpop.permute.xlu1 %948  ;;  %v180_v14 = vpop.permute.xlu0 %179 }
  0xee   :  { %vm1085_vm6 = vcmp.eq.s32.totalorder %v949_v13, %v3154_v26  ;;  %vm316_vm7 = vcmp.eq.s32.totalorder %v180_v14, %v3154_v26  ;;  %1044 = vperm.xlu1 %2864, %v861_v11   ;;  %275 = vperm.xlu0 %2863, %v90_v12  }
  0xef   :  { %2515 = vmatmul.mubr.msk.f32.gmra.mrb[26].mxu0 %vm316_vm7, %v2890_v31  ;;  %2643 = vmatmul.mubr.msk.f32.gmra.mrb[26].mxu1 %vm1085_vm6, %v2890_v31 }
  0xf1   :  { %v952_v17 = vpop.permute.xlu1 %951  ;;  %v183_v18 = vpop.permute.xlu0 %182 }
  0xf2   :  { %vm1086_vm8 = vcmp.eq.s32.totalorder %v952_v17, %v3154_v26  ;;  %vm317_vm9 = vcmp.eq.s32.totalorder %v183_v18, %v3154_v26  ;;  %1047 = vperm.xlu1 %2864, %v862_v15   ;;  %278 = vperm.xlu0 %2863, %v91_v16  }
  0xf3   :  { %2517 = vmatprep.mubr.msk.f32.mxu0 %vm317_vm9, %v2890_v31  ;;  %2645 = vmatprep.mubr.msk.f32.mxu1 %vm1086_vm8, %v2890_v31 }
  0xf5   :  { %v955_v21 = vpop.permute.xlu1 %954  ;;  %v186_v22 = vpop.permute.xlu0 %185 }
  0xf6   :  { %vm1087_vm10 = vcmp.eq.s32.totalorder %v955_v21, %v3154_v26  ;;  %vm318_vm11 = vcmp.eq.s32.totalorder %v186_v22, %v3154_v26  ;;  %1050 = vperm.xlu1 %2864, %v863_v19   ;;  %281 = vperm.xlu0 %2863, %v92_v20  }
  0xf7   :  { %2518 = vmatmul.mubr.msk.f32.gmra.mrb[28].mxu0 %vm318_vm11, %v2890_v31  ;;  %2646 = vmatmul.mubr.msk.f32.gmra.mrb[28].mxu1 %vm1087_vm10, %v2890_v31 }
  0xf9   :  { %v958_v27 = vpop.permute.xlu1 %957  ;;  %v189_v28 = vpop.permute.xlu0 %188 }
  0xfa   :  { %vm1088_vm12 = vcmp.eq.s32.totalorder %v958_v27, %v3154_v26  ;;  %vm319_vm13 = vcmp.eq.s32.totalorder %v189_v28, %v3154_v26  ;;  %1053 = vperm.xlu1 %2864, %v864_v24   ;;  %284 = vperm.xlu0 %2863, %v93_v25  }
  0xfb   :  { %2520 = vmatprep.mubr.msk.f32.mxu0 %vm319_vm13, %v2890_v31  ;;  %2648 = vmatprep.mubr.msk.f32.mxu1 %vm1088_vm12, %v2890_v31 }
  0xfd   :  { %v961_v32 = vpop.permute.xlu1 %960  ;;  %v192_v33 = vpop.permute.xlu0 %191 }
  0xfe   :  { %vm1089_vm14 = vcmp.eq.s32.totalorder %v961_v32, %v3154_v26  ;;  %vm320_vm15 = vcmp.eq.s32.totalorder %v192_v33, %v3154_v26  ;;  %1056 = vperm.xlu1 %2864, %v865_v29   ;;  %287 = vperm.xlu0 %2863, %v94_v30  }
  0xff   :  { %2521 = vmatmul.mubr.msk.f32.gmra.mrb[30].mxu0 %vm320_vm15, %v2890_v31  ;;  %2649 = vmatmul.mubr.msk.f32.gmra.mrb[30].mxu1 %vm1089_vm14, %v2890_v31 }
 0x101   :  { %v964_v34 = vpop.permute.xlu1 %963  ;;  %v195_v35 = vpop.permute.xlu0 %194 }
 0x102   :  { %vm1090_vm0 = vcmp.eq.s32.totalorder %v964_v34, %v3154_v26  ;;  %vm321_vm1 = vcmp.eq.s32.totalorder %v195_v35, %v3154_v26 }
 0x103   :  { %2523 = vmatprep.mubr.msk.f32.mxu0 %vm321_vm1, %v2890_v31  ;;  %2651 = vmatprep.mubr.msk.f32.mxu1 %vm1090_vm0, %v2890_v31 }
 0x105   :  { %v967_v36 = vpop.permute.xlu1 %966  ;;  %v198_v37 = vpop.permute.xlu0 %197 }
 0x106   :  { %vm1091_vm2 = vcmp.eq.s32.totalorder %v967_v36, %v3154_v26  ;;  %vm322_vm3 = vcmp.eq.s32.totalorder %v198_v37, %v3154_v26 }
 0x107   :  { %2524 = vmatmul.mubr.msk.f32.gmra.mrb[32].mxu0 %vm322_vm3, %v2890_v31  ;;  %2652 = vmatmul.mubr.msk.f32.gmra.mrb[32].mxu1 %vm1091_vm2, %v2890_v31 }
 0x109   :  { %v970_v38 = vpop.permute.xlu1 %969  ;;  %v201_v39 = vpop.permute.xlu0 %200 }
 0x10a   :  { %vm1092_vm4 = vcmp.eq.s32.totalorder %v970_v38, %v3154_v26  ;;  %vm323_vm5 = vcmp.eq.s32.totalorder %v201_v39, %v3154_v26 }
 0x10b   :  { %2526 = vmatprep.mubr.msk.f32.mxu0 %vm323_vm5, %v2890_v31  ;;  %2654 = vmatprep.mubr.msk.f32.mxu1 %vm1092_vm4, %v2890_v31 }
 0x10d   :  { %v973_v40 = vpop.permute.xlu1 %972  ;;  %v204_v41 = vpop.permute.xlu0 %203 }
 0x10e   :  { %vm1093_vm6 = vcmp.eq.s32.totalorder %v973_v40, %v3154_v26  ;;  %vm324_vm7 = vcmp.eq.s32.totalorder %v204_v41, %v3154_v26 }
 0x10f   :  { %2527 = vmatmul.mubr.msk.f32.gmra.mrb[34].mxu0 %vm324_vm7, %v2890_v31  ;;  %2655 = vmatmul.mubr.msk.f32.gmra.mrb[34].mxu1 %vm1093_vm6, %v2890_v31 }
 0x111   :  { %v976_v42 = vpop.permute.xlu1 %975  ;;  %v207_v43 = vpop.permute.xlu0 %206 }
 0x112   :  { %vm1094_vm8 = vcmp.eq.s32.totalorder %v976_v42, %v3154_v26  ;;  %vm325_vm9 = vcmp.eq.s32.totalorder %v207_v43, %v3154_v26 }
 0x113   :  { %2529 = vmatprep.mubr.msk.f32.mxu0 %vm325_vm9, %v2890_v31  ;;  %2657 = vmatprep.mubr.msk.f32.mxu1 %vm1094_vm8, %v2890_v31 }
 0x115   :  { %v979_v44 = vpop.permute.xlu1 %978  ;;  %v210_v45 = vpop.permute.xlu0 %209 }
 0x116   :  { %vm1095_vm10 = vcmp.eq.s32.totalorder %v979_v44, %v3154_v26  ;;  %vm326_vm11 = vcmp.eq.s32.totalorder %v210_v45, %v3154_v26 }
 0x117   :  { %2530 = vmatmul.mubr.msk.f32.gmra.mrb[36].mxu0 %vm326_vm11, %v2890_v31  ;;  %2658 = vmatmul.mubr.msk.f32.gmra.mrb[36].mxu1 %vm1095_vm10, %v2890_v31 }
 0x119   :  { %v982_v46 = vpop.permute.xlu1 %981  ;;  %v213_v47 = vpop.permute.xlu0 %212 }
 0x11a   :  { %vm1096_vm12 = vcmp.eq.s32.totalorder %v982_v46, %v3154_v26  ;;  %vm327_vm13 = vcmp.eq.s32.totalorder %v213_v47, %v3154_v26 }
 0x11b   :  { %2532 = vmatprep.mubr.msk.f32.mxu0 %vm327_vm13, %v2890_v31  ;;  %2660 = vmatprep.mubr.msk.f32.mxu1 %vm1096_vm12, %v2890_v31 }
 0x11d   :  { %v985_v48 = vpop.permute.xlu1 %984  ;;  %v216_v49 = vpop.permute.xlu0 %215 }
 0x11e   :  { %vm1097_vm14 = vcmp.eq.s32.totalorder %v985_v48, %v3154_v26  ;;  %vm328_vm15 = vcmp.eq.s32.totalorder %v216_v49, %v3154_v26 }
 0x11f   :  { %2533 = vmatmul.mubr.msk.f32.gmra.mrb[38].mxu0 %vm328_vm15, %v2890_v31  ;;  %2661 = vmatmul.mubr.msk.f32.gmra.mrb[38].mxu1 %vm1097_vm14, %v2890_v31 }
 0x121   :  { %v988_v50 = vpop.permute.xlu1 %987  ;;  %v219_v51 = vpop.permute.xlu0 %218 }
 0x122   :  { %vm1098_vm0 = vcmp.eq.s32.totalorder %v988_v50, %v3154_v26  ;;  %vm329_vm1 = vcmp.eq.s32.totalorder %v219_v51, %v3154_v26 }
 0x123   :  { %2535 = vmatprep.mubr.msk.f32.mxu0 %vm329_vm1, %v2890_v31  ;;  %2663 = vmatprep.mubr.msk.f32.mxu1 %vm1098_vm0, %v2890_v31 }
 0x125   :  { %v991_v52 = vpop.permute.xlu1 %990  ;;  %v222_v53 = vpop.permute.xlu0 %221 }
 0x126   :  { %vm1099_vm2 = vcmp.eq.s32.totalorder %v991_v52, %v3154_v26  ;;  %vm330_vm3 = vcmp.eq.s32.totalorder %v222_v53, %v3154_v26 }
 0x127   :  { %2536 = vmatmul.mubr.msk.f32.gmra.mrb[40].mxu0 %vm330_vm3, %v2890_v31  ;;  %2664 = vmatmul.mubr.msk.f32.gmra.mrb[40].mxu1 %vm1099_vm2, %v2890_v31 }
 0x129   :  { %v994_v54 = vpop.permute.xlu1 %993  ;;  %v225_v55 = vpop.permute.xlu0 %224 }
 0x12a   :  { %vm1100_vm4 = vcmp.eq.s32.totalorder %v994_v54, %v3154_v26  ;;  %vm331_vm5 = vcmp.eq.s32.totalorder %v225_v55, %v3154_v26 }
 0x12b   :  { %2538 = vmatprep.mubr.msk.f32.mxu0 %vm331_vm5, %v2890_v31  ;;  %2666 = vmatprep.mubr.msk.f32.mxu1 %vm1100_vm4, %v2890_v31 }
 0x12d   :  { %v997_v56 = vpop.permute.xlu1 %996  ;;  %v228_v57 = vpop.permute.xlu0 %227 }
 0x12e   :  { %vm1101_vm6 = vcmp.eq.s32.totalorder %v997_v56, %v3154_v26  ;;  %vm332_vm7 = vcmp.eq.s32.totalorder %v228_v57, %v3154_v26 }
 0x12f   :  { %2539 = vmatmul.mubr.msk.f32.gmra.mrb[42].mxu0 %vm332_vm7, %v2890_v31  ;;  %2667 = vmatmul.mubr.msk.f32.gmra.mrb[42].mxu1 %vm1101_vm6, %v2890_v31 }
 0x131   :  { %v1000_v58 = vpop.permute.xlu1 %999  ;;  %v231_v59 = vpop.permute.xlu0 %230 }
 0x132   :  { %vm1102_vm8 = vcmp.eq.s32.totalorder %v1000_v58, %v3154_v26  ;;  %vm333_vm9 = vcmp.eq.s32.totalorder %v231_v59, %v3154_v26 }
 0x133   :  { %2541 = vmatprep.mubr.msk.f32.mxu0 %vm333_vm9, %v2890_v31  ;;  %2669 = vmatprep.mubr.msk.f32.mxu1 %vm1102_vm8, %v2890_v31 }
 0x135   :  { %v1003_v60 = vpop.permute.xlu1 %1002  ;;  %v234_v61 = vpop.permute.xlu0 %233 }
 0x136   :  { %vm1103_vm10 = vcmp.eq.s32.totalorder %v1003_v60, %v3154_v26  ;;  %vm334_vm11 = vcmp.eq.s32.totalorder %v234_v61, %v3154_v26 }
 0x137   :  { %2542 = vmatmul.mubr.msk.f32.gmra.mrb[44].mxu0 %vm334_vm11, %v2890_v31  ;;  %2670 = vmatmul.mubr.msk.f32.gmra.mrb[44].mxu1 %vm1103_vm10, %v2890_v31 }
 0x139   :  { %v1006_v62 = vpop.permute.xlu1 %1005  ;;  %v237_v63 = vpop.permute.xlu0 %236 }
 0x13a   :  { %vm1104_vm12 = vcmp.eq.s32.totalorder %v1006_v62, %v3154_v26  ;;  %vm335_vm13 = vcmp.eq.s32.totalorder %v237_v63, %v3154_v26 }
 0x13b   :  { %2544 = vmatprep.mubr.msk.f32.mxu0 %vm335_vm13, %v2890_v31  ;;  %2672 = vmatprep.mubr.msk.f32.mxu1 %vm1104_vm12, %v2890_v31 }
 0x13d   :  { %v1009_v0 = vpop.permute.xlu1 %1008  ;;  %v240_v1 = vpop.permute.xlu0 %239 }
 0x13e   :  { %vm1105_vm14 = vcmp.eq.s32.totalorder %v1009_v0, %v3154_v26  ;;  %vm336_vm15 = vcmp.eq.s32.totalorder %v240_v1, %v3154_v26 }
 0x13f   :  { %2545 = vmatmul.mubr.msk.f32.gmra.mrb[46].mxu0 %vm336_vm15, %v2890_v31  ;;  %2673 = vmatmul.mubr.msk.f32.gmra.mrb[46].mxu1 %vm1105_vm14, %v2890_v31 }
 0x141   :  { %v1012_v2 = vpop.permute.xlu1 %1011  ;;  %v243_v3 = vpop.permute.xlu0 %242 }
 0x142   :  { %vm1106_vm0 = vcmp.eq.s32.totalorder %v1012_v2, %v3154_v26  ;;  %vm337_vm1 = vcmp.eq.s32.totalorder %v243_v3, %v3154_v26 }
 0x143   :  { %2547 = vmatprep.mubr.msk.f32.mxu0 %vm337_vm1, %v2890_v31  ;;  %2675 = vmatprep.mubr.msk.f32.mxu1 %vm1106_vm0, %v2890_v31 }
 0x145   :  { %v1015_v4 = vpop.permute.xlu1 %1014  ;;  %v246_v5 = vpop.permute.xlu0 %245 }
 0x146   :  { %vm1107_vm2 = vcmp.eq.s32.totalorder %v1015_v4, %v3154_v26  ;;  %vm338_vm3 = vcmp.eq.s32.totalorder %v246_v5, %v3154_v26 }
 0x147   :  { %2548 = vmatmul.mubr.msk.f32.gmra.mrb[48].mxu0 %vm338_vm3, %v2890_v31  ;;  %2676 = vmatmul.mubr.msk.f32.gmra.mrb[48].mxu1 %vm1107_vm2, %v2890_v31 }
 0x149   :  { %v1018_v6 = vpop.permute.xlu1 %1017  ;;  %v249_v7 = vpop.permute.xlu0 %248 }
 0x14a   :  { %vm1108_vm4 = vcmp.eq.s32.totalorder %v1018_v6, %v3154_v26  ;;  %vm339_vm5 = vcmp.eq.s32.totalorder %v249_v7, %v3154_v26 }
 0x14b   :  { %2550 = vmatprep.mubr.msk.f32.mxu0 %vm339_vm5, %v2890_v31  ;;  %2678 = vmatprep.mubr.msk.f32.mxu1 %vm1108_vm4, %v2890_v31 }
 0x14d   :  { %v1021_v8 = vpop.permute.xlu1 %1020  ;;  %v252_v9 = vpop.permute.xlu0 %251 }
 0x14e   :  { %vm1109_vm6 = vcmp.eq.s32.totalorder %v1021_v8, %v3154_v26  ;;  %vm340_vm7 = vcmp.eq.s32.totalorder %v252_v9, %v3154_v26 }
 0x14f   :  { %2551 = vmatmul.mubr.msk.f32.gmra.mrb[50].mxu0 %vm340_vm7, %v2890_v31  ;;  %2679 = vmatmul.mubr.msk.f32.gmra.mrb[50].mxu1 %vm1109_vm6, %v2890_v31 }
 0x151   :  { %v1024_v10 = vpop.permute.xlu1 %1023  ;;  %v255_v11 = vpop.permute.xlu0 %254 }
 0x152   :  { %vm1110_vm8 = vcmp.eq.s32.totalorder %v1024_v10, %v3154_v26  ;;  %vm341_vm9 = vcmp.eq.s32.totalorder %v255_v11, %v3154_v26 }
 0x153   :  { %2553 = vmatprep.mubr.msk.f32.mxu0 %vm341_vm9, %v2890_v31  ;;  %2681 = vmatprep.mubr.msk.f32.mxu1 %vm1110_vm8, %v2890_v31 }
 0x155   :  { %v1027_v12 = vpop.permute.xlu1 %1026  ;;  %v258_v13 = vpop.permute.xlu0 %257 }
 0x156   :  { %vm1111_vm10 = vcmp.eq.s32.totalorder %v1027_v12, %v3154_v26  ;;  %vm342_vm11 = vcmp.eq.s32.totalorder %v258_v13, %v3154_v26 }
 0x157   :  { %v2477_v14 = vpop.f32.mrb[0].mxu0  ;;  %2554 = vmatmul.mubr.msk.f32.gmra.mrb[52].mxu0 %vm342_vm11, %v2890_v31  ;;  %2682 = vmatmul.mubr.msk.f32.gmra.mrb[52].mxu1 %vm1111_vm10, %v2890_v31 }
 0x158   :  { %v483_v15 = vpop.f32.mrb[1].mxu0 }
 0x159   :  { %v1030_v16 = vpop.permute.xlu1 %1029  ;;  %v261_v17 = vpop.permute.xlu0 %260 }
 0x15a   :  { %vm1112_vm12 = vcmp.eq.s32.totalorder %v1030_v16, %v3154_v26  ;;  %vm343_vm13 = vcmp.eq.s32.totalorder %v261_v17, %v3154_v26 }
 0x15b   :  { %2556 = vmatprep.mubr.msk.f32.mxu0 %vm343_vm13, %v2890_v31  ;;  %v2605_v18 = vpop.f32.mrb[0].mxu1  ;;  %2684 = vmatprep.mubr.msk.f32.mxu1 %vm1112_vm12, %v2890_v31 }
 0x15c   :  { %v3568_v19 = vmul.f32 %v2605_v18, %v2477_v14  ;;  %v1252_v20 = vpop.f32.mrb[1].mxu1 }
 0x15d   :  { %v3570_v21 = vmul.f32 %v1252_v20, %v483_v15  ;;  %v1033_v22 = vpop.permute.xlu1 %1032  ;;  %v264_v24 = vpop.permute.xlu0 %263 }
 0x15e   :  { %vm1113_vm14 = vcmp.eq.s32.totalorder %v1033_v22, %v3154_v26  ;;  %vm344_vm15 = vcmp.eq.s32.totalorder %v264_v24, %v3154_v26 }
 0x15f   :  { %v2766_v25 = vpack.c.bf16 %v3568_v19, %v3570_v21  ;;  %2557 = vmatmul.mubr.msk.f32.gmra.mrb[54].mxu0 %vm344_vm15, %v2890_v31  ;;  %2685 = vmatmul.mubr.msk.f32.gmra.mrb[54].mxu1 %vm1113_vm14, %v2890_v31 }
 0x161   :  { %v1036_v27 = vpop.permute.xlu1 %1035  ;;  %v267_v28 = vpop.permute.xlu0 %266 }
 0x162   :  { %vm1114_vm0 = vcmp.eq.s32.totalorder %v1036_v27, %v3154_v26  ;;  %vm345_vm1 = vcmp.eq.s32.totalorder %v267_v28, %v3154_v26  ;;  %v2480_v29 = vpop.f32.mrb[2].mxu0  ;;  %v2608_v30 = vpop.f32.mrb[2].mxu1 }
 0x163   :  { %v3580_v32 = vmul.f32 %v2608_v30, %v2480_v29  ;;  %v493_v33 = vpop.f32.mrb[3].mxu0  ;;  %2559 = vmatprep.mubr.msk.f32.mxu0 %vm345_vm1, %v2890_v31  ;;  %v1262_v34 = vpop.f32.mrb[3].mxu1  ;;  %2687 = vmatprep.mubr.msk.f32.mxu1 %vm1114_vm0, %v2890_v31  ;;  %vm1635_vm0 = vcmask 261120  }
 0x164   :  { %v3584_v35 = vmul.f32 %v1262_v34, %v493_v33  ;;  %vm3658_vm1 = vmpackc.low %vm1635_vm0, %vm1635_vm0 }
 0x165   :  { %v1039_v36 = vpop.permute.xlu1 %1038  ;;  %v270_v37 = vpop.permute.xlu0 %269 }
 0x166   :  { %v2772_v38 = vpack.c.bf16 %v3580_v32, %v3584_v35  ;;  %vm1115_vm2 = vcmp.eq.s32.totalorder %v1039_v36, %v3154_v26  ;;  %vm346_vm3 = vcmp.eq.s32.totalorder %v270_v37, %v3154_v26 }
 0x167   :  { %2560 = vmatmul.mubr.msk.f32.gmra.mrb[56].mxu0 %vm346_vm3, %v2890_v31  ;;  %2688 = vmatmul.mubr.msk.f32.gmra.mrb[56].mxu1 %vm1115_vm2, %v2890_v31  ;;  %vm2004_vm2 = vcmp.lt.s32.totalorder %v95_v23, 512 }
 0x169   :  { %v1042_v39 = vpop.permute.xlu1 %1041  ;;  %v273_v40 = vpop.permute.xlu0 %272 }
 0x16a   :  { %vm1116_vm4 = vcmp.eq.s32.totalorder %v1042_v39, %v3154_v26  ;;  %vm347_vm5 = vcmp.eq.s32.totalorder %v273_v40, %v3154_v26  ;;  %v2483_v41 = vpop.f32.mrb[4].mxu0  ;;  %v2611_v42 = vpop.f32.mrb[4].mxu1 }
 0x16b   :  { %v3594_v43 = vmul.f32 %v2611_v42, %v2483_v41  ;;  %v503_v44 = vpop.f32.mrb[5].mxu0  ;;  %2562 = vmatprep.mubr.msk.f32.mxu0 %vm347_vm5, %v2890_v31  ;;  %v1272_v45 = vpop.f32.mrb[5].mxu1  ;;  %2690 = vmatprep.mubr.msk.f32.mxu1 %vm1116_vm4, %v2890_v31 }
 0x16c   :  { %v3598_v46 = vmul.f32 %v1272_v45, %v503_v44 }
 0x16d   :  { %v1045_v47 = vpop.permute.xlu1 %1044  ;;  %v276_v48 = vpop.permute.xlu0 %275 }
 0x16e   :  { %v2778_v49 = vpack.c.bf16 %v3594_v43, %v3598_v46  ;;  %vm1117_vm6 = vcmp.eq.s32.totalorder %v1045_v47, %v3154_v26  ;;  %vm348_vm7 = vcmp.eq.s32.totalorder %v276_v48, %v3154_v26 }
 0x16f   :  { %2563 = vmatmul.mubr.msk.f32.gmra.mrb[58].mxu0 %vm348_vm7, %v2890_v31  ;;  %2691 = vmatmul.mubr.msk.f32.gmra.mrb[58].mxu1 %vm1117_vm6, %v2890_v31 }
 0x171   :  { %v1048_v50 = vpop.permute.xlu1 %1047  ;;  %v279_v51 = vpop.permute.xlu0 %278 }
 0x172   :  { %vm1118_vm8 = vcmp.eq.s32.totalorder %v1048_v50, %v3154_v26  ;;  %vm349_vm9 = vcmp.eq.s32.totalorder %v279_v51, %v3154_v26  ;;  %v2486_v52 = vpop.f32.mrb[6].mxu0  ;;  %v2614_v53 = vpop.f32.mrb[6].mxu1 }
 0x173   :  { %v3608_v54 = vmul.f32 %v2614_v53, %v2486_v52  ;;  %v513_v55 = vpop.f32.mrb[7].mxu0  ;;  %2565 = vmatprep.mubr.msk.f32.mxu0 %vm349_vm9, %v2890_v31  ;;  %v1282_v56 = vpop.f32.mrb[7].mxu1  ;;  %2693 = vmatprep.mubr.msk.f32.mxu1 %vm1118_vm8, %v2890_v31 }
 0x174   :  { %v3612_v57 = vmul.f32 %v1282_v56, %v513_v55 }
 0x175   :  { %v1051_v58 = vpop.permute.xlu1 %1050  ;;  %v282_v59 = vpop.permute.xlu0 %281 }
 0x176   :  { %v2784_v60 = vpack.c.bf16 %v3608_v54, %v3612_v57  ;;  %vm1119_vm10 = vcmp.eq.s32.totalorder %v1051_v58, %v3154_v26  ;;  %vm350_vm11 = vcmp.eq.s32.totalorder %v282_v59, %v3154_v26 }
 0x177   :  { %2566 = vmatmul.mubr.msk.f32.gmra.mrb[60].mxu0 %vm350_vm11, %v2890_v31  ;;  %2694 = vmatmul.mubr.msk.f32.gmra.mrb[60].mxu1 %vm1119_vm10, %v2890_v31 }
 0x179   :  { %v1054_v61 = vpop.permute.xlu1 %1053  ;;  %v285_v62 = vpop.permute.xlu0 %284 }
 0x17a   :  { %vm1120_vm12 = vcmp.eq.s32.totalorder %v1054_v61, %v3154_v26  ;;  %vm351_vm13 = vcmp.eq.s32.totalorder %v285_v62, %v3154_v26  ;;  %v2489_v63 = vpop.f32.mrb[8].mxu0  ;;  %v2617_v0 = vpop.f32.mrb[8].mxu1 }
 0x17b   :  { %v3622_v1 = vmul.f32 %v2617_v0, %v2489_v63  ;;  %v523_v2 = vpop.f32.mrb[9].mxu0  ;;  %2568 = vmatprep.mubr.msk.f32.mxu0 %vm351_vm13, %v2890_v31  ;;  %v1292_v3 = vpop.f32.mrb[9].mxu1  ;;  %2696 = vmatprep.mubr.msk.f32.mxu1 %vm1120_vm12, %v2890_v31 }
 0x17c   :  { %v3626_v4 = vmul.f32 %v1292_v3, %v523_v2 }
 0x17d   :  { %v1057_v5 = vpop.permute.xlu1 %1056  ;;  %v288_v6 = vpop.permute.xlu0 %287 }
 0x17e   :  { %v2790_v7 = vpack.c.bf16 %v3622_v1, %v3626_v4  ;;  %vm1121_vm14 = vcmp.eq.s32.totalorder %v1057_v5, %v3154_v26  ;;  %vm352_vm15 = vcmp.eq.s32.totalorder %v288_v6, %v3154_v26 }
 0x17f   :  { %2569 = vmatmul.mubr.msk.f32.gmra.mrb[62].mxu0 %vm352_vm15, %v2890_v31  ;;  %2697 = vmatmul.mubr.msk.f32.gmra.mrb[62].mxu1 %vm1121_vm14, %v2890_v31 }
 0x180   :  { %2407 = vmatprep.mubr.msk.f32.mxu0 %vm1635_vm0, %v2890_v31  ;;  %2441 = vmatprep.mubr.msk.f32.mxu1 %vm1635_vm0, %v2890_v31 }
 0x182   :  { %v2492_v8 = vpop.f32.mrb[10].mxu0  ;;  %v2620_v9 = vpop.f32.mrb[10].mxu1 }
 0x183   :  { %v3638_v10 = vmul.f32 %v2620_v9, %v2492_v8  ;;  %v533_v11 = vpop.f32.mrb[11].mxu0  ;;  %v1302_v12 = vpop.f32.mrb[11].mxu1 }
 0x184   :  { %v3640_v13 = vmul.f32 %v1302_v12, %v533_v11 }
 0x186   :  { %v2796_v26 = vpack.c.bf16 %v3638_v10, %v3640_v13 }
 0x18a   :  { %v2495_v14 = vpop.f32.mrb[12].mxu0  ;;  %v2623_v15 = vpop.f32.mrb[12].mxu1 }
 0x18b   :  { %v3644_v16 = vmul.f32 %v2623_v15, %v2495_v14  ;;  %v543_v17 = vpop.f32.mrb[13].mxu0  ;;  %v1312_v18 = vpop.f32.mrb[13].mxu1 }
 0x18c   :  { %v3646_v20 = vmul.f32 %v1312_v18, %v543_v17 }
 0x18e   :  { %v2802_v22 = vpack.c.bf16 %v3644_v16, %v3646_v20 }
 0x192   :  { %v2498_v24 = vpop.f32.mrb[14].mxu0  ;;  %v2626_v27 = vpop.f32.mrb[14].mxu1 }
 0x193   :  { %v3650_v28 = vmul.f32 %v2626_v27, %v2498_v24  ;;  %v553_v29 = vpop.f32.mrb[15].mxu0  ;;  %v1322_v30 = vpop.f32.mrb[15].mxu1 }
 0x194   :  { %v3652_v33 = vmul.f32 %v1322_v30, %v553_v29 }
 0x196   :  { %v2808_v34 = vpack.c.bf16 %v3650_v28, %v3652_v33 }
 0x19a   :  { %v2501_v36 = vpop.f32.mrb[16].mxu0  ;;  %v2629_v37 = vpop.f32.mrb[16].mxu1 }
 0x19b   :  { %v1588_v39 = vmul.f32 %v2629_v37, %v2501_v36  ;;  %v563_v40 = vpop.f32.mrb[17].mxu0  ;;  %v1332_v41 = vpop.f32.mrb[17].mxu1 }
 0x19c   :  { %v1587_v42 = vmul.f32 %v1332_v41, %v563_v40 }
 0x19e   :  { %v2763_v45 = vpack.c.bf16 %v1588_v39, %v1587_v42 }
 0x1a0   :  { %2765 = vmatprep.subr.msk.bf16.mxu0 %vm3658_vm1, %v2763_v45 }
 0x1a1   :  { %2768 = vmatpush3.bf16.xpose.msk.msra.mxu0 %vm3658_vm1, %v2766_v25 }
 0x1a2   :  { %v2504_v47 = vpop.f32.mrb[18].mxu0  ;;  %v2632_v48 = vpop.f32.mrb[18].mxu1 }
 0x1a3   :  { %v1590_v50 = vmul.f32 %v2632_v48, %v2504_v47  ;;  %v573_v51 = vpop.f32.mrb[19].mxu0  ;;  %v1342_v52 = vpop.f32.mrb[19].mxu1 }
 0x1a4   :  { %v1589_v53 = vmul.f32 %v1342_v52, %v573_v51 }
 0x1a6   :  { %v2769_v55 = vpack.c.bf16 %v1590_v50, %v1589_v53 }
 0x1a8   :  { %2771 = vmatprep.subr.msk.bf16.mxu0 %vm3658_vm1, %v2769_v55 }
 0x1a9   :  { %2774 = vmatpush3.bf16.xpose.msk.msra.mxu0 %vm3658_vm1, %v2772_v38 }
 0x1aa   :  { %v2507_v19 = vpop.f32.mrb[20].mxu0  ;;  %v2635_v21 = vpop.f32.mrb[20].mxu1 }
 0x1ab   :  { %v1592_v56 = vmul.f32 %v2635_v21, %v2507_v19  ;;  %v583_v25 = vpop.f32.mrb[21].mxu0  ;;  %v1352_v58 = vpop.f32.mrb[21].mxu1 }
 0x1ac   :  { %v1591_v59 = vmul.f32 %v1352_v58, %v583_v25 }
 0x1ae   :  { %v2775_v61 = vpack.c.bf16 %v1592_v56, %v1591_v59 }
 0x1b0   :  { %2777 = vmatprep.subr.msk.bf16.mxu0 %vm3658_vm1, %v2775_v61 }
 0x1b1   :  { %2780 = vmatpush3.bf16.xpose.msk.msra.mxu0 %vm3658_vm1, %v2778_v49 }
 0x1b2   :  { %v2510_v32 = vpop.f32.mrb[22].mxu0  ;;  %v2638_v35 = vpop.f32.mrb[22].mxu1 }
 0x1b3   :  { %v1594_v62 = vmul.f32 %v2638_v35, %v2510_v32  ;;  %v593_v38 = vpop.f32.mrb[23].mxu0  ;;  %v1362_v63 = vpop.f32.mrb[23].mxu1 }
 0x1b4   :  { %v1593_v0 = vmul.f32 %v1362_v63, %v593_v38 }
 0x1b6   :  { %v2781_v2 = vpack.c.bf16 %v1594_v62, %v1593_v0 }
 0x1b8   :  { %2783 = vmatprep.subr.msk.bf16.mxu0 %vm3658_vm1, %v2781_v2 }
 0x1b9   :  { %2786 = vmatpush3.bf16.xpose.msk.msra.mxu0 %vm3658_vm1, %v2784_v60 }
 0x1ba   :  { %v2513_v43 = vpop.f32.mrb[24].mxu0  ;;  %v2641_v46 = vpop.f32.mrb[24].mxu1 }
 0x1bb   :  { %v1596_v3 = vmul.f32 %v2641_v46, %v2513_v43  ;;  %v603_v49 = vpop.f32.mrb[25].mxu0  ;;  %v1372_v5 = vpop.f32.mrb[25].mxu1 }
 0x1bc   :  { %v1595_v6 = vmul.f32 %v1372_v5, %v603_v49 }
 0x1be   :  { %v2787_v8 = vpack.c.bf16 %v1596_v3, %v1595_v6 }
 0x1c0   :  { %2789 = vmatprep.subr.msk.bf16.mxu0 %vm3658_vm1, %v2787_v8 }
 0x1c1   :  { %2792 = vmatpush3.bf16.xpose.msk.msra.mxu0 %vm3658_vm1, %v2790_v7 }
 0x1c2   :  { %v2516_v54 = vpop.f32.mrb[26].mxu0  ;;  %v2644_v57 = vpop.f32.mrb[26].mxu1 }
 0x1c3   :  { %v1598_v9 = vmul.f32 %v2644_v57, %v2516_v54  ;;  %v613_v60 = vpop.f32.mrb[27].mxu0  ;;  %v1382_v11 = vpop.f32.mrb[27].mxu1 }
 0x1c4   :  { %v1597_v12 = vmul.f32 %v1382_v11, %v613_v60 }
 0x1c6   :  { %v2793_v14 = vpack.c.bf16 %v1598_v9, %v1597_v12 }
 0x1c8   :  { %2795 = vmatprep.subr.msk.bf16.mxu0 %vm3658_vm1, %v2793_v14 }
 0x1c9   :  { %2798 = vmatpush3.bf16.xpose.msk.msra.mxu0 %vm3658_vm1, %v2796_v26 }
 0x1ca   :  { %v2519_v1 = vpop.f32.mrb[28].mxu0  ;;  %v2647_v4 = vpop.f32.mrb[28].mxu1 }
 0x1cb   :  { %v1600_v15 = vmul.f32 %v2647_v4, %v2519_v1  ;;  %v623_v7 = vpop.f32.mrb[29].mxu0  ;;  %v1392_v17 = vpop.f32.mrb[29].mxu1 }
 0x1cc   :  { %v1599_v18 = vmul.f32 %v1392_v17, %v623_v7 }
 0x1ce   :  { %v2799_v24 = vpack.c.bf16 %v1600_v15, %v1599_v18 }
 0x1d0   :  { %2801 = vmatprep.subr.msk.bf16.mxu0 %vm3658_vm1, %v2799_v24 }
 0x1d1   :  { %2804 = vmatpush3.bf16.xpose.msk.msra.mxu0 %vm3658_vm1, %v2802_v22 }
 0x1d2   :  { %v2522_v10 = vpop.f32.mrb[30].mxu0  ;;  %v2650_v13 = vpop.f32.mrb[30].mxu1 }
 0x1d3   :  { %v1602_v27 = vmul.f32 %v2650_v13, %v2522_v10  ;;  %v633_v26 = vpop.f32.mrb[31].mxu0  ;;  %v1402_v29 = vpop.f32.mrb[31].mxu1 }
 0x1d4   :  { %v1601_v30 = vmul.f32 %v1402_v29, %v633_v26 }
 0x1d6   :  { %v2805_v36 = vpack.c.bf16 %v1602_v27, %v1601_v30 }
 0x1d8   :  { %2807 = vmatprep.subr.msk.bf16.mxu0 %vm3658_vm1, %v2805_v36 }
 0x1d9   :  { %2810 = vmatpush3.bf16.xpose.msk.msra.mxu0 %vm3658_vm1, %v2808_v34 }
 0x1da   :  { %v2525_v16 = vpop.f32.mrb[32].mxu0  ;;  %v2653_v20 = vpop.f32.mrb[32].mxu1 }
 0x1db   :  { %v3718_v37 = vmul.f32 %v2653_v20, %v2525_v16  ;;  %v643_v22 = vpop.f32.mrb[33].mxu0  ;;  %v1412_v39 = vpop.f32.mrb[33].mxu1 }
 0x1dc   :  { %v1603_v40 = vmul.f32 %v1412_v39, %v643_v22 }
 0x1de   :  { %v2814_v41 = vpack.c.bf16 %v3718_v37, %v1603_v40 }
 0x1e0   :  { %2408 = vmatmul.mubr.msk.f32.vlgmr.msra.gmra.mrb[64].mxu0 %vm1635_vm0, %v2890_v31 }
 0x1e2   :  { %v2528_v42 = vpop.f32.mrb[34].mxu0  ;;  %v2656_v45 = vpop.f32.mrb[34].mxu1 }
 0x1e3   :  { %v3723_v47 = vmul.f32 %v2656_v45, %v2528_v42  ;;  %v653_v28 = vpop.f32.mrb[35].mxu0  ;;  %v1422_v33 = vpop.f32.mrb[35].mxu1 }
 0x1e4   :  { %v1605_v48 = vmul.f32 %v1422_v33, %v653_v28 }
 0x1e6   :  { %v2820_v34 = vpack.c.bf16 %v3723_v47, %v1605_v48 }
 0x1ea   :  { %v2531_v50 = vpop.f32.mrb[36].mxu0  ;;  %v2659_v51 = vpop.f32.mrb[36].mxu1 }
 0x1eb   :  { %v3726_v52 = vmul.f32 %v2659_v51, %v2531_v50  ;;  %v663_v53 = vpop.f32.mrb[37].mxu0  ;;  %v1432_v55 = vpop.f32.mrb[37].mxu1 }
 0x1ec   :  { %v3728_v19 = vmul.f32 %v1432_v55, %v663_v53 }
 0x1ee   :  { %v2826_v21 = vpack.c.bf16 %v3726_v52, %v3728_v19 }
 0x1f2   :  { %v2534_v56 = vpop.f32.mrb[38].mxu0  ;;  %v2662_v25 = vpop.f32.mrb[38].mxu1 }
 0x1f3   :  { %v3732_v58 = vmul.f32 %v2662_v25, %v2534_v56  ;;  %v673_v59 = vpop.f32.mrb[39].mxu0  ;;  %v1442_v61 = vpop.f32.mrb[39].mxu1 }
 0x1f4   :  { %v3734_v32 = vmul.f32 %v1442_v61, %v673_v59 }
 0x1f6   :  { %v2832_v35 = vpack.c.bf16 %v3732_v58, %v3734_v32 }
 0x1fa   :  { %v2537_v62 = vpop.f32.mrb[40].mxu0  ;;  %v2665_v38 = vpop.f32.mrb[40].mxu1 }
 0x1fb   :  { %v3738_v63 = vmul.f32 %v2665_v38, %v2537_v62  ;;  %v683_v0 = vpop.f32.mrb[41].mxu0  ;;  %v1452_v2 = vpop.f32.mrb[41].mxu1 }
 0x1fc   :  { %v3740_v43 = vmul.f32 %v1452_v2, %v683_v0 }
 0x1fe   :  { %v2838_v46 = vpack.c.bf16 %v3738_v63, %v3740_v43 }
 0x202   :  { %v2540_v3 = vpop.f32.mrb[42].mxu0  ;;  %v2668_v49 = vpop.f32.mrb[42].mxu1 }
 0x203   :  { %v3744_v5 = vmul.f32 %v2668_v49, %v2540_v3  ;;  %v693_v6 = vpop.f32.mrb[43].mxu0  ;;  %v1462_v8 = vpop.f32.mrb[43].mxu1 }
 0x204   :  { %v3746_v54 = vmul.f32 %v1462_v8, %v693_v6 }
 0x206   :  { %v2844_v57 = vpack.c.bf16 %v3744_v5, %v3746_v54 }
 0x20a   :  { %v2543_v9 = vpop.f32.mrb[44].mxu0  ;;  %v2671_v60 = vpop.f32.mrb[44].mxu1 }
 0x20b   :  { %v3750_v11 = vmul.f32 %v2671_v60, %v2543_v9  ;;  %v703_v12 = vpop.f32.mrb[45].mxu0  ;;  %v1472_v14 = vpop.f32.mrb[45].mxu1 }
 0x20c   :  { %v3752_v1 = vmul.f32 %v1472_v14, %v703_v12 }
 0x20e   :  { %v2850_v4 = vpack.c.bf16 %v3750_v11, %v3752_v1 }
 0x212   :  { %v2546_v15 = vpop.f32.mrb[46].mxu0  ;;  %v2674_v7 = vpop.f32.mrb[46].mxu1 }
 0x213   :  { %v3756_v17 = vmul.f32 %v2674_v7, %v2546_v15  ;;  %v713_v18 = vpop.f32.mrb[47].mxu0  ;;  %v1482_v24 = vpop.f32.mrb[47].mxu1 }
 0x214   :  { %v3758_v10 = vmul.f32 %v1482_v24, %v713_v18 }
 0x216   :  { %v2856_v13 = vpack.c.bf16 %v3756_v17, %v3758_v10 }
 0x21a   :  { %v2549_v27 = vpop.f32.mrb[48].mxu0  ;;  %v2677_v26 = vpop.f32.mrb[48].mxu1 }
 0x21b   :  { %v1620_v29 = vmul.f32 %v2677_v26, %v2549_v27  ;;  %v723_v30 = vpop.f32.mrb[49].mxu0  ;;  %v1492_v36 = vpop.f32.mrb[49].mxu1  ;;  %v2891_v26 = vmov 1966171168  }
 0x21c   :  { %v1619_v16 = vmul.f32 %v1492_v36, %v723_v30  ;;  %v1983_v36 = vshrl.u32 %v95_v23, 7 }
 0x21e   :  { %v2811_v20 = vpack.c.bf16 %v1620_v29, %v1619_v16  ;;  %v1980_v29 = vunpack.c.l.s4 %v2891_v26 }
 0x220   :  { %2813 = vmatprep.subr.msk.bf16.mxu1 %vm3658_vm1, %v2811_v20  ;;  %v1981_v30 = vunpack.c.0.s8 %v1980_v29 }
 0x221   :  { %2816 = vmatpush3.bf16.xpose.msk.msra.mxu1 %vm3658_vm1, %v2814_v41 }
 0x222   :  { %v2552_v37 = vpop.f32.mrb[50].mxu0  ;;  %v2680_v22 = vpop.f32.mrb[50].mxu1  ;;  %v1984_v16 = vsub.s32 %v1981_v30, %v1983_v36 }
 0x223   :  { %v1622_v39 = vmul.f32 %v2680_v22, %v2552_v37  ;;  %v733_v40 = vpop.f32.mrb[51].mxu0  ;;  %v1502_v42 = vpop.f32.mrb[51].mxu1 }
 0x224   :  { %v1621_v45 = vmul.f32 %v1502_v42, %v733_v40 }
 0x226   :  { %v2817_v47 = vpack.c.bf16 %v1622_v39, %v1621_v45 }
 0x228   :  { %2819 = vmatprep.subr.msk.bf16.mxu1 %vm3658_vm1, %v2817_v47 }
 0x229   :  { %2822 = vmatpush3.bf16.xpose.msk.msra.mxu1 %vm3658_vm1, %v2820_v34 }
 0x22a   :  { %v2555_v28 = vpop.f32.mrb[52].mxu0  ;;  %v2683_v33 = vpop.f32.mrb[52].mxu1 }
 0x22b   :  { %v1624_v48 = vmul.f32 %v2683_v33, %v2555_v28  ;;  %v743_v50 = vpop.f32.mrb[53].mxu0  ;;  %v1512_v51 = vpop.f32.mrb[53].mxu1 }
 0x22c   :  { %v1623_v52 = vmul.f32 %v1512_v51, %v743_v50 }
 0x22e   :  { %v2823_v41 = vpack.c.bf16 %v1624_v48, %v1623_v52 }
 0x230   :  { %2825 = vmatprep.subr.msk.bf16.mxu1 %vm3658_vm1, %v2823_v41 }
 0x231   :  { %2828 = vmatpush3.bf16.xpose.msk.msra.mxu1 %vm3658_vm1, %v2826_v21 }
 0x232   :  { %v2558_v53 = vpop.f32.mrb[54].mxu0  ;;  %v2686_v55 = vpop.f32.mrb[54].mxu1 }
 0x233   :  { %v1626_v19 = vmul.f32 %v2686_v55, %v2558_v53  ;;  %v753_v56 = vpop.f32.mrb[55].mxu0  ;;  %v1522_v25 = vpop.f32.mrb[55].mxu1 }
 0x234   :  { %v1625_v59 = vmul.f32 %v1522_v25, %v753_v56 }
 0x236   :  { %v2829_v34 = vpack.c.bf16 %v1626_v19, %v1625_v59 }
 0x238   :  { %2831 = vmatprep.subr.msk.bf16.mxu1 %vm3658_vm1, %v2829_v34 }
 0x239   :  { %2834 = vmatpush3.bf16.xpose.msk.msra.mxu1 %vm3658_vm1, %v2832_v35 }
 0x23a   :  { %v2561_v61 = vpop.f32.mrb[56].mxu0  ;;  %v2689_v62 = vpop.f32.mrb[56].mxu1 }
 0x23b   :  { %v1628_v38 = vmul.f32 %v2689_v62, %v2561_v61  ;;  %v763_v21 = vpop.f32.mrb[57].mxu0  ;;  %v1532_v0 = vpop.f32.mrb[57].mxu1 }
 0x23c   :  { %v1627_v2 = vmul.f32 %v1532_v0, %v763_v21 }
 0x23e   :  { %v2835_v3 = vpack.c.bf16 %v1628_v38, %v1627_v2 }
 0x240   :  { %2837 = vmatprep.subr.msk.bf16.mxu1 %vm3658_vm1, %v2835_v3 }
 0x241   :  { %2840 = vmatpush3.bf16.xpose.msk.msra.mxu1 %vm3658_vm1, %v2838_v46 }
 0x242   :  { %v2564_v58 = vpop.f32.mrb[58].mxu0  ;;  %v2692_v32 = vpop.f32.mrb[58].mxu1 }
 0x243   :  { %v1630_v49 = vmul.f32 %v2692_v32, %v2564_v58  ;;  %v773_v35 = vpop.f32.mrb[59].mxu0  ;;  %v1542_v6 = vpop.f32.mrb[59].mxu1 }
 0x244   :  { %v1629_v8 = vmul.f32 %v1542_v6, %v773_v35 }
 0x246   :  { %v2841_v9 = vpack.c.bf16 %v1630_v49, %v1629_v8 }
 0x248   :  { %2843 = vmatprep.subr.msk.bf16.mxu1 %vm3658_vm1, %v2841_v9 }
 0x249   :  { %2846 = vmatpush3.bf16.xpose.msk.msra.mxu1 %vm3658_vm1, %v2844_v57 }
 0x24a   :  { %v2567_v63 = vpop.f32.mrb[60].mxu0  ;;  %v2695_v43 = vpop.f32.mrb[60].mxu1 }
 0x24b   :  { %v1632_v60 = vmul.f32 %v2695_v43, %v2567_v63  ;;  %v783_v46 = vpop.f32.mrb[61].mxu0  ;;  %v1552_v12 = vpop.f32.mrb[61].mxu1 }
 0x24c   :  { %v1631_v14 = vmul.f32 %v1552_v12, %v783_v46 }
 0x24e   :  { %v2847_v15 = vpack.c.bf16 %v1632_v60, %v1631_v14 }
 0x250   :  { %2849 = vmatprep.subr.msk.bf16.mxu1 %vm3658_vm1, %v2847_v15 }
 0x251   :  { %2852 = vmatpush3.bf16.xpose.msk.msra.mxu1 %vm3658_vm1, %v2850_v4 }
 0x252   :  { %v2570_v5 = vpop.f32.mrb[62].mxu0  ;;  %v2698_v54 = vpop.f32.mrb[62].mxu1 }
 0x253   :  { %v1634_v7 = vmul.f32 %v2698_v54, %v2570_v5  ;;  %v793_v57 = vpop.f32.mrb[63].mxu0  ;;  %v1562_v18 = vpop.f32.mrb[63].mxu1 }
 0x254   :  { %v1633_v24 = vmul.f32 %v1562_v18, %v793_v57 }
 0x256   :  { %v2853_v27 = vpack.c.bf16 %v1634_v7, %v1633_v24 }
 0x258   :  { %2855 = vmatprep.subr.msk.bf16.mxu1 %vm3658_vm1, %v2853_v27 }
 0x259   :  { %2858 = vmatpush3.bf16.xpose.msk.msra.mxu1 %vm3658_vm1, %v2856_v13 }
 0x260   :  { %2442 = vmatmul.mubr.msk.f32.vlgmr.msra.gmra.mrb[64].mxu1 %vm1635_vm0, %v2890_v31 }
 0x2b3   :  { %v1897_v11 = vpop.f32.mrb[64].mxu0 }
 0x2b4   :  { %v1899_v1 = vpop.f32.mrb[65].mxu0 }
 0x2b5   :  { %v1977_v4 = vcombine.low %v1897_v11, %v1899_v1 }
 0x2b7   :  { %v1985_v22 = vrot.slane %v1977_v4, %v1984_v16 }
 0x333   :  { %v1968_v20 = vpop.f32.mrb[64].mxu1 }
 0x334   :  { %v1970_v37 = vpop.f32.mrb[65].mxu1 }
 0x335   :  { %v1978_v39 = vcombine.low %v1968_v20, %v1970_v37 }
 0x337   :  { %v1992_v17 = vrot.slane %v1978_v39, %v1984_v16 }
 0x339   :  { %v1993_v44 = vcombine.low %v1985_v22, %v1992_v17 }
 0x33b   :  { %v2000_v31 = vrot.slane %v1993_v44, %v1984_v16 }
 0x33d   :  { %2006 = vst.msk [vmem:[#allocation2] sm:$0xf] %vm2004_vm2, %v2000_v31 }
 0x33e   :  { %2876 = shalt.err (!%p2873_p4)
}
 0x33f   :  { %s2877_s25 = scalar_lea.hbm %s3828_s3, 64 }
 0x340   :  { %p2878_p5 = scmp.ne.s32.totalorder %s3828_s3, %s2877_s25  ;;  %p2881_p6 = scmp.lt.u32.totalorder %s2877_s25, %s3828_s3 }
 0x342   :  { %p2883_p7 = pnand %p2881_p6, %p2878_p5 }
 0x344   :  { %2886 = shalt.err (!%p2883_p7)
}
 0x345   :  { %2016 = dma.vmem_to_hbm [thread:$0]  %s2014_s2, 64, %s3828_s3, [#allocation3]  }
 0x346   :  { %2887 = dma.done.wait [#allocation3], 64  }
 0x347   :  { %2888 = vsyncadd [#allocation3], 4294967232 }
 0x348   :  { %2020 = vsyncpa [#allocation3], 1 }

</bundles_post_ra>
